<compile_context>
chip_gen: v5e
topology: v5e:2x2
jax: 0.10.0
libtpu: 0.0.40
codegen_flags: <defaults>
</compile_context>

<pallas_src>
import functools

import jax
import jax.numpy as jnp
from jax.experimental import pallas as pl
from jax.experimental.pallas import tpu as pltpu

EMBED_DIM = 32            # stands in for CFG.embed_dim
NUM_CLASSES = 10000       # len(range(10000))

_CLASS_ALIGN = 256        # pad classes to a lane/MXU friendly multiple
_MAX_TILE_BATCH = 128     # (128, 10240) f32 logits ~ 5 MB; VMEM-safe on v7x
_PAD_CLASS_BIAS = -30000.0  # finite sentinel: exp underflows to 0, bf16-safe


def _cac_kernel(q_ref, db_ref, wlbl_ref, w_ref, loss_ref, *, temperature):
    """One batch tile: attention -> z -> full-class logits -> per-sample CE."""
    # ---- retrieval / cross-attention ---------------------------------------
    qs = q_ref[...] * temperature                        # (TB, D_aug) f32
    db = db_ref[...]                                     # (N,  D_aug) f32
    att = jax.lax.dot_general(                           # q @ db.T  -> (TB, N)
        qs, db, (((1,), (1,)), ((), ())),
        preferred_element_type=jnp.float32)
    att_max = jnp.max(att, axis=-1, keepdims=True)
    p = jnp.exp(att - att_max)                           # unnormalized softmax
    s = jnp.sum(p, axis=-1, keepdims=True)
    z_un = jnp.dot(p, db, preferred_element_type=jnp.float32)   # (TB, D_aug)
    # Deferred normalization; db's appended ones-column makes z_aug[:, D] ~= 1,
    # which picks up the bias row folded into the packed fc weight.
    z_aug = (z_un * pl.reciprocal(s, approx=True)).astype(jnp.bfloat16)

    # ---- classifier: one resident (D_aug, Cp) bf16 weight, bias folded in ---
    logits = jnp.dot(z_aug, w_ref[...],
                     preferred_element_type=jnp.float32)         # (TB, Cp)
    m = jnp.max(logits, axis=-1, keepdims=True)
    lse = m + jnp.log(jnp.sum(jnp.exp(logits - m), axis=-1, keepdims=True))

    # Label logit (+bias) from the pre-gathered label column (TB, D_aug).
    lbl = jnp.sum(z_aug.astype(jnp.float32) * wlbl_ref[...].astype(jnp.float32),
                  axis=-1, keepdims=True)

    loss_ref[...] = (lse - lbl).astype(loss_ref.dtype)


def prepare_fc_params(weight, bias, class_align=_CLASS_ALIGN):
    """One-time repack of nn.Linear(D, C) params (call at init, NOT per step).

    Returns a (D_aug, Cp) bf16 matrix: rows [0:D] = W.T, row D = bias, remaining
    rows = 0.  Padded classes get bias = _PAD_CLASS_BIAS so they never win the
    row max and exp() underflows to 0 in the f32 softmax path.
    """
    C, D = weight.shape
    Cp = -(-C // class_align) * class_align
    d_aug = -(-(D + 1) // 16) * 16          # bf16 sublane-packing friendly
    w = jnp.zeros((d_aug, Cp), jnp.float32)
    w = w.at[:D, :C].set(weight.T.astype(jnp.float32))
    w = w.at[D, :C].set(bias.astype(jnp.float32))
    w = w.at[D, C:].set(_PAD_CLASS_BIAS)
    return w.astype(jnp.bfloat16)


def _pick_batch_tile(batch, max_tb=_MAX_TILE_BATCH):
    """Minimize batch padding; keep >=2 grid steps for v7x megacore when possible."""
    nb = max(-(-batch // max_tb), 1)
    if batch >= 16:
        nb = max(nb, 2)
    tb = -(-batch // nb)
    return -(-tb // 8) * 8


@jax.jit
def cac_loss(q, db_vecs, db_labels, w_aug):
    """q: (B, D); db_vecs: (N, D); db_labels: (B, L) int;
    w_aug: persistent pre-packed fc params from prepare_fc_params()."""
    B, D = q.shape
    N = db_vecs.shape[0]
    d_aug, Cp = w_aug.shape
    assert d_aug >= D + 1, "fc params must come from prepare_fc_params()"

    TB = _pick_batch_tile(B)
    Bp = -(-B // TB) * TB
    nb = Bp // TB

    # Label fc-column (+bias row) gathered OUTSIDE the kernel: (B, D_aug) bf16.
    y = db_labels[:, 0].astype(jnp.int32)
    w_lbl = jnp.take(w_aug, y, axis=1).T
    w_lbl = jnp.zeros((Bp, d_aug), jnp.bfloat16).at[:B].set(w_lbl)

    # q zero-padded to D_aug (so the att contraction ignores the aug columns);
    # db gets a ones column at index D (produces z's "bias pickup" column).
    q_aug = jnp.zeros((Bp, d_aug), jnp.float32).at[:B, :D].set(
        q.astype(jnp.float32))
    db_aug = (jnp.zeros((N, d_aug), jnp.float32)
              .at[:, :D].set(db_vecs.astype(jnp.float32))
              .at[:, D].set(1.0))

    kernel = functools.partial(_cac_kernel, temperature=float(D) ** -0.5)

    cost = pl.CostEstimate(
        flops=2 * Bp * N * d_aug * 2 + 2 * Bp * d_aug * Cp + 2 * Bp * d_aug,
        transcendentals=Bp * N + Bp * Cp + Bp,
        bytes_accessed=(Bp * d_aug * 4 + N * d_aug * 4 + Bp * d_aug * 2
                        + d_aug * Cp * 2 + Bp * 4),
    )

    per_sample = pl.pallas_call(
        kernel,
        out_shape=jax.ShapeDtypeStruct((Bp, 1), jnp.float32),
        grid=(nb,),
        in_specs=[
            pl.BlockSpec((TB, d_aug), lambda b: (b, 0)),    # q (padded to D_aug)
            pl.BlockSpec((N, d_aug), lambda b: (0, 0)),     # db_vecs (+ones col), resident
            pl.BlockSpec((TB, d_aug), lambda b: (b, 0)),    # label fc column
            pl.BlockSpec((d_aug, Cp), lambda b: (0, 0)),    # packed fc weight, resident
        ],
        out_specs=pl.BlockSpec((TB, 1), lambda b: (b, 0)),
        compiler_params=pltpu.CompilerParams(
            dimension_semantics=("parallel",),
            vmem_limit_bytes=48 * 1024 * 1024,
        ),
        cost_estimate=cost,
    )(q_aug, db_aug, w_lbl, w_aug)

    # Mean over the true batch (padded rows discarded).
    return jnp.mean(per_sample[:B, 0])


def _reference_loss(q, db_vecs, db_labels, weight, bias):
    D = q.shape[-1]
    att = (q @ db_vecs.T) * (D ** -0.5)
    w = jax.nn.softmax(att, axis=-1)
    z = w @ db_vecs
    logits = z @ weight.T + bias
    logp = jax.nn.log_softmax(logits, axis=-1)
    y = db_labels[:, 0].astype(jnp.int32)
    return -jnp.mean(jnp.take_along_axis(logp, y[:, None], axis=-1))


if __name__ == "__main__":
    key = jax.random.PRNGKey(0)
    kq, kdb, kl, kw, kb = jax.random.split(key, 5)

    B, D, N, C = 8, EMBED_DIM, 64, NUM_CLASSES

    q = jax.random.normal(kq, (B, D), jnp.float32)
    db_vecs = jax.random.normal(kdb, (N, D), jnp.float32)
    db_labels = jax.random.randint(kl, (B, 2), 0, C, jnp.int32)

    # Deterministic nn.Linear(D, C) params (PyTorch-style uniform init bounds).
    bound = 1.0 / (D ** 0.5)
    weight = jax.random.uniform(kw, (C, D), jnp.float32, -bound, bound)
    bias = jax.random.uniform(kb, (C,), jnp.float32, -bound, bound)

    # One-time persistent repack (bf16, bias folded, class padding).
    w_aug = jax.block_until_ready(prepare_fc_params(weight, bias))

    loss = cac_loss(q, db_vecs, db_labels, w_aug)
    jax.block_until_ready(loss)

    ref = _reference_loss(q, db_vecs, db_labels, weight, bias)
    # bf16 weight/z rounding gives ~1e-3-level absolute error on a ~9.2 loss.
    assert jnp.allclose(loss, ref, atol=2e-2, rtol=2e-2), (loss, ref)

    print("KERNEL_OK")
</pallas_src>

<mosaic_0001>
module attributes {stable_mosaic.version = 11 : i64} {
  func.func @_cac_kernel(%arg0: i32, %arg1: memref<8x48xf32, #tpu.memory_space<vmem>>, %arg2: memref<64x48xf32, #tpu.memory_space<vmem>>, %arg3: memref<8x48xbf16, #tpu.memory_space<vmem>>, %arg4: memref<48x10240xbf16, #tpu.memory_space<vmem>>, %arg5: memref<8x1xf32, #tpu.memory_space<vmem>>) attributes {dimension_semantics = [#tpu.dimension_semantics<parallel>], iteration_bounds = array<i64: 1>, scalar_prefetch = 0 : i64, scratch_operands = 0 : i64, tpu.core_type = #tpu.core_type<tc>, window_params = [{transform_indices = @transform_0, window_bounds = array<i64: 8, 48>}, {pipeline_mode = #tpu.pipeline_mode<synchronous>, transform_indices = @transform_1, window_bounds = array<i64: 64, 48>}, {transform_indices = @transform_2, window_bounds = array<i64: 8, 48>}, {pipeline_mode = #tpu.pipeline_mode<synchronous>, transform_indices = @transform_3, window_bounds = array<i64: 48, 10240>}, {transform_indices = @transform_4, window_bounds = array<i64: 8, 1>}]} {
    %c0 = arith.constant 0 : index
    %c0_0 = arith.constant 0 : index
    %0 = vector.load %arg1[%c0, %c0_0] : memref<8x48xf32, #tpu.memory_space<vmem>>, vector<8x48xf32>
    %cst = arith.constant 0.176776692 : f32
    %1 = vector.broadcast %cst : f32 to vector<8x48xf32>
    %2 = arith.mulf %0, %1 : vector<8x48xf32>
    %c0_1 = arith.constant 0 : index
    %c0_2 = arith.constant 0 : index
    %3 = vector.load %arg2[%c0_1, %c0_2] : memref<64x48xf32, #tpu.memory_space<vmem>>, vector<64x48xf32>
    %cst_3 = arith.constant dense<0.000000e+00> : vector<8x64xf32>
    %4 = tpu.matmul %2, %3, %cst_3 {dimension_numbers = #tpu.dot_dimension_numbers<[1], [1], [0], [0], [0, 0, 1, 0], [], []>} : vector<8x48xf32>, vector<64x48xf32>, vector<8x64xf32> -> vector<8x64xf32>
    %cst_4 = arith.constant dense<0xFF800000> : vector<8xf32>
    %5 = vector.multi_reduction <maximumf>, %4, %cst_4 [1] : vector<8x64xf32> to vector<8xf32>
    %6 = vector.shape_cast %5 : vector<8xf32> to vector<8x1xf32>
    %7 = vector.broadcast %6 : vector<8x1xf32> to vector<8x64xf32>
    %8 = arith.subf %4, %7 : vector<8x64xf32>
    %9 = math.exp %8 : vector<8x64xf32>
    %cst_5 = arith.constant dense<0.000000e+00> : vector<8xf32>
    %10 = vector.multi_reduction <add>, %9, %cst_5 [1] : vector<8x64xf32> to vector<8xf32>
    %11 = vector.shape_cast %10 : vector<8xf32> to vector<8x1xf32>
    %cst_6 = arith.constant dense<0.000000e+00> : vector<8x48xf32>
    %12 = tpu.matmul %9, %3, %cst_6 {dimension_numbers = #tpu.dot_dimension_numbers<[1], [0], [0], [1], [0, 0, 1, 1], [], []>} : vector<8x64xf32>, vector<64x48xf32>, vector<8x48xf32> -> vector<8x48xf32>
    %13 = tpu.reciprocal %11 {approx = true} : vector<8x1xf32> -> vector<8x1xf32>
    %14 = vector.broadcast %13 : vector<8x1xf32> to vector<8x48xf32>
    %15 = arith.mulf %12, %14 : vector<8x48xf32>
    %16 = arith.truncf %15 : vector<8x48xf32> to vector<8x48xbf16>
    %c0_7 = arith.constant 0 : index
    %c0_8 = arith.constant 0 : index
    %17 = vector.load %arg4[%c0_7, %c0_8] : memref<48x10240xbf16, #tpu.memory_space<vmem>>, vector<48x10240xbf16>
    %cst_9 = arith.constant dense<0.000000e+00> : vector<8x10240xf32>
    %18 = tpu.matmul %16, %17, %cst_9 {dimension_numbers = #tpu.dot_dimension_numbers<[1], [0], [0], [1], [0, 0, 1, 1], [], []>} : vector<8x48xbf16>, vector<48x10240xbf16>, vector<8x10240xf32> -> vector<8x10240xf32>
    %cst_10 = arith.constant dense<0xFF800000> : vector<8xf32>
    %19 = vector.multi_reduction <maximumf>, %18, %cst_10 [1] : vector<8x10240xf32> to vector<8xf32>
    %20 = vector.shape_cast %19 : vector<8xf32> to vector<8x1xf32>
    %21 = vector.broadcast %20 : vector<8x1xf32> to vector<8x10240xf32>
    %22 = arith.subf %18, %21 : vector<8x10240xf32>
    %23 = math.exp %22 : vector<8x10240xf32>
    %cst_11 = arith.constant dense<0.000000e+00> : vector<8xf32>
    %24 = vector.multi_reduction <add>, %23, %cst_11 [1] : vector<8x10240xf32> to vector<8xf32>
    %25 = vector.shape_cast %24 : vector<8xf32> to vector<8x1xf32>
    %26 = math.log %25 : vector<8x1xf32>
    %27 = arith.addf %20, %26 : vector<8x1xf32>
    %28 = arith.extf %16 : vector<8x48xbf16> to vector<8x48xf32>
    %c0_12 = arith.constant 0 : index
    %c0_13 = arith.constant 0 : index
    %29 = vector.load %arg3[%c0_12, %c0_13] : memref<8x48xbf16, #tpu.memory_space<vmem>>, vector<8x48xbf16>
    %30 = arith.extf %29 : vector<8x48xbf16> to vector<8x48xf32>
    %31 = arith.mulf %28, %30 : vector<8x48xf32>
    %cst_14 = arith.constant dense<0.000000e+00> : vector<8xf32>
    %32 = vector.multi_reduction <add>, %31, %cst_14 [1] : vector<8x48xf32> to vector<8xf32>
    %33 = vector.shape_cast %32 : vector<8xf32> to vector<8x1xf32>
    %34 = arith.subf %27, %33 : vector<8x1xf32>
    %c0_15 = arith.constant 0 : index
    %c0_16 = arith.constant 0 : index
    %35 = vector.load %arg5[%c0_15, %c0_16] : memref<8x1xf32, #tpu.memory_space<vmem>>, vector<8x1xf32>
    tpu.vector_store %arg5[%c0_15, %c0_16], %34 {strides = array<i32>} : memref<8x1xf32, #tpu.memory_space<vmem>>, vector<8x1xf32>,
    return
  }
  func.func @transform_0(%arg0: i32) -> (i32, i32) {
    %c0_i32 = arith.constant 0 : i32
    %c0_i32_0 = arith.constant 0 : i32
    return %arg0, %c0_i32 : i32, i32
  }
  func.func @transform_1(%arg0: i32) -> (i32, i32) {
    %c0_i32 = arith.constant 0 : i32
    %c0_i32_0 = arith.constant 0 : i32
    %c0_i32_1 = arith.constant 0 : i32
    return %c0_i32, %c0_i32_0 : i32, i32
  }
  func.func @transform_2(%arg0: i32) -> (i32, i32) {
    %c0_i32 = arith.constant 0 : i32
    %c0_i32_0 = arith.constant 0 : i32
    return %arg0, %c0_i32 : i32, i32
  }
  func.func @transform_3(%arg0: i32) -> (i32, i32) {
    %c0_i32 = arith.constant 0 : i32
    %c0_i32_0 = arith.constant 0 : i32
    %c0_i32_1 = arith.constant 0 : i32
    return %c0_i32, %c0_i32_0 : i32, i32
  }
  func.func @transform_4(%arg0: i32) -> (i32, i32) {
    %c0_i32 = arith.constant 0 : i32
    %c0_i32_0 = arith.constant 0 : i32
    return %arg0, %c0_i32 : i32, i32
  }
}

</mosaic_0001>

<bundles_post_ra>
// kernel: cac_loss.1
= control target key start
LH: loop header
LB: loop body
LE: loop exit
PB: predicated region body
PF: predicated region fallthrough
CT: control target
= control target key end

     0   :  { %vm28_vm0 = vcmask 392192   ;;  %vm76_vm1 = vcmask 523264   ;;  %vm3008_vm2 = vcmask 7168   ;;  %s6544_s1 = inlined_call_operand.vmem [shape: f32[64,48], index: 1, kind: input, shape index: {}]   ;;  %s6545_s0 = inlined_call_operand.vmem [shape: f32[8,48], index: 0, kind: input, shape index: {}]   ;;  %s6546_s3 = inlined_call_operand.vmem [shape: bf16[48,10240], index: 3, kind: input, shape index: {}]   ;;  %s6547_s2 = inlined_call_operand.vmem [shape: bf16[8,48], index: 2, kind: input, shape index: {}]   ;;  %s6548_s4 = inlined_call_operand.vmem [shape: f32[8,1], index: 4, kind: output, shape index: {}]  }
   0x1   :  { %v27_v0 = vld [vmem:[%s6544_s1 + $0x38] sm:$0xff]  ;;  %v26_v1 = vld [vmem:[%s6544_s1 + $0x30] sm:$0xff]  ;;  %v25_v2 = vld [vmem:[%s6544_s1 + $0x28] sm:$0xff] }
   0x2   :  { %3014 = vmatpush.xpose.msk.msra.mxu0 %vm28_vm0, %v27_v0  ;;  %97 = vmatpush.msra.mxu1 %v27_v0  ;;  %v24_v3 = vld [vmem:[%s6544_s1 + $0x20] sm:$0xff]  ;;  %v23_v4 = vld [vmem:[%s6544_s1 + $0x18] sm:$0xff]  ;;  %v22_v5 = vld [vmem:[%s6544_s1 + $0x10] sm:$0xff] }
   0x3   :  { %v21_v6 = vld [vmem:[%s6544_s1 + $0x8] sm:$0xff]  ;;  %v20_v7 = vld [vmem:[%s6544_s1] sm:$0xff]  ;;  %v4226_v26 = vld [vmem:[%s6546_s3 + $0x514] sm:$0xf] }
   0x4   :  { %98 = vmatpush.msra.mxu1 %v26_v1  ;;  %v18_v8 = vld [vmem:[%s6545_s0] sm:$0xff]  ;;  %v3674_v22 = vld [vmem:[%s6546_s3 + $0x508] sm:$0xf]  ;;  %v3684_v27 = vld [vmem:[%s6546_s3 + $0x650] sm:$0xf0] }
   0x5   :  { %v19_v9 = vmul.f32 0.17677669, %v18_v8  ;;  %v3666_v17 = vld [vmem:[%s6546_s3 + $0x500] sm:$0xf]  ;;  %v4224_v19 = vld [vmem:[%s6546_s3 + $0x504] sm:$0xf]  ;;  %v3687_v29 = vor.u32 %v4226_v26, %v3684_v27 }
   0x6   :  { %3015 = vmatpush.xpose.msk.msra.mxu0 %vm28_vm0, %v26_v1  ;;  %99 = vmatpush.msra.mxu1 %v25_v2  ;;  %v4264_v18 = vld [vmem:[%s6546_s3 + $0x63c] sm:$0xf0]  ;;  %v3668_v21 = vld [vmem:[%s6546_s3 + $0x640] sm:$0xf0]  ;;  %v4265_v23 = vld [vmem:[%s6546_s3 + $0x644] sm:$0xf0] }
   0x7   :  { %v3667_v20 = vor.u32 %v4264_v18, %v3666_v17  ;;  %v3671_v24 = vor.u32 %v4224_v19, %v3668_v21  ;;  %v3675_v25 = vor.u32 %v4265_v23, %v3674_v22  ;;  %v3346_v28 = vld [vmem:[%s6546_s3 + $0x280] sm:$0xf]  ;;  %v4144_v31 = vld [vmem:[%s6546_s3 + $0x284] sm:$0xf]  ;;  %v3354_v35 = vld [vmem:[%s6546_s3 + $0x288] sm:$0xf] }
   0x8   :  { %100 = vmatpush.msra.mxu1 %v24_v3  ;;  %v4184_v30 = vld [vmem:[%s6546_s3 + $0x3bc] sm:$0xf0]  ;;  %v3348_v32 = vld [vmem:[%s6546_s3 + $0x3c0] sm:$0xf0]  ;;  %v4185_v36 = vld [vmem:[%s6546_s3 + $0x3c4] sm:$0xf0] }
   0x9   :  { %1560 = vmatpush.bf16.msra.mxu2 %v3667_v20  ;;  %1573 = vmatpush.bf16.msra.mxu3 %v3671_v24  ;;  %v3347_v33 = vor.u32 %v4184_v30, %v3346_v28  ;;  %v3351_v34 = vor.u32 %v4144_v31, %v3348_v32  ;;  %v4146_v37 = vld [vmem:[%s6546_s3 + $0x294] sm:$0xf]  ;;  %v3355_v38 = vor.u32 %v4185_v36, %v3354_v35  ;;  %v3026_v41 = vld [vmem:[%s6546_s3] sm:$0xf]  ;;  %v4064_v43 = vld [vmem:[%s6546_s3 + $0x4] sm:$0xf] }
   0xa   :  { %3016 = vmatpush.xpose.msk.msra.mxu0 %vm28_vm0, %v25_v2  ;;  %101 = vmatpush.msra.mxu1 %v23_v4  ;;  %v3364_v39 = vld [vmem:[%s6546_s3 + $0x3d0] sm:$0xf0]  ;;  %v4104_v42 = vld [vmem:[%s6546_s3 + $0x13c] sm:$0xf0]  ;;  %v3028_v45 = vld [vmem:[%s6546_s3 + $0x140] sm:$0xf0] }
   0xb   :  { %v3367_v40 = vor.u32 %v4146_v37, %v3364_v39  ;;  %v3027_v44 = vor.u32 %v4104_v42, %v3026_v41  ;;  %v3034_v46 = vld [vmem:[%s6546_s3 + $0x8] sm:$0xf]  ;;  %v3031_v48 = vor.u32 %v4064_v43, %v3028_v45  ;;  %v4066_v50 = vld [vmem:[%s6546_s3 + $0x14] sm:$0xf]  ;;  %v4225_v53 = vld [vmem:[%s6546_s3 + $0x50c] sm:$0xf] }
   0xc   :  { %102 = vmatpush.msra.mxu1 %v22_v5  ;;  %v4105_v47 = vld [vmem:[%s6546_s3 + $0x144] sm:$0xf0]  ;;  %v3044_v51 = vld [vmem:[%s6546_s3 + $0x150] sm:$0xf0]  ;;  %v3676_v54 = vld [vmem:[%s6546_s3 + $0x648] sm:$0xf0] }
   0xd   :  { %1561 = vmatpush.bf16.msra.mxu2 %v3347_v33  ;;  %1574 = vmatpush.bf16.msra.mxu3 %v3351_v34  ;;  %v3035_v49 = vor.u32 %v4105_v47, %v3034_v46  ;;  %v3047_v52 = vor.u32 %v4066_v50, %v3044_v51  ;;  %v3682_v55 = vld [vmem:[%s6546_s3 + $0x510] sm:$0xf]  ;;  %v3679_v56 = vor.u32 %v4225_v53, %v3676_v54  ;;  %v3690_v58 = vld [vmem:[%s6546_s3 + $0x518] sm:$0xf]  ;;  %v4228_v62 = vld [vmem:[%s6546_s3 + $0x524] sm:$0xf] }
   0xe   :  { %3017 = vmatpush.xpose.msk.msra.mxu0 %vm28_vm0, %v24_v3  ;;  %103 = vmatpush.msra.mxu1 %v21_v6  ;;  %v4266_v57 = vld [vmem:[%s6546_s3 + $0x64c] sm:$0xf0]  ;;  %v4267_v59 = vld [vmem:[%s6546_s3 + $0x654] sm:$0xf0]  ;;  %v3700_v63 = vld [vmem:[%s6546_s3 + $0x660] sm:$0xf0] }
   0xf   :  { %v3683_v60 = vor.u32 %v4266_v57, %v3682_v55  ;;  %v3691_v61 = vor.u32 %v4267_v59, %v3690_v58  ;;  %v3703_v0 = vor.u32 %v4228_v62, %v3700_v63  ;;  %v4145_v1 = vld [vmem:[%s6546_s3 + $0x28c] sm:$0xf]  ;;  %v3362_v3 = vld [vmem:[%s6546_s3 + $0x290] sm:$0xf]  ;;  %v3050_v19 = vld [vmem:[%s6546_s3 + $0x18] sm:$0xf] }
  0x10   :  { %104 = vmatpush.msra.mxu1 %v20_v7  ;;  %v3356_v2 = vld [vmem:[%s6546_s3 + $0x3c8] sm:$0xf0]  ;;  %v4107_v20 = vld [vmem:[%s6546_s3 + $0x154] sm:$0xf0]  ;;  %v4068_v21 = vld [vmem:[%s6546_s3 + $0x24] sm:$0xf] }
  0x11   :  { %1562 = vmatpush.bf16.msra.mxu2 %v3027_v44  ;;  %1575 = vmatpush.bf16.msra.mxu3 %v3031_v48  ;;  %v3051_v22 = vor.u32 %v4107_v20, %v3050_v19  ;;  %v3060_v23 = vld [vmem:[%s6546_s3 + $0x160] sm:$0xf0]  ;;  %v3001_v26 = vld [vmem:[%s6547_s2] sm:$0xf]  ;;  %v4227_v27 = vld [vmem:[%s6546_s3 + $0x51c] sm:$0xf] }
  0x12   :  { %3018 = vmatpush.xpose.msk.msra.mxu0 %vm28_vm0, %v23_v4  ;;  %1586 = vmatpush.bf16.msrb.mxu1 %v3675_v25  ;;  %v3359_v4 = vor.u32 %v4145_v1, %v3356_v2  ;;  %v3063_v24 = vor.u32 %v4068_v21, %v3060_v23  ;;  %v3692_v28 = vld [vmem:[%s6546_s3 + $0x658] sm:$0xf0]  ;;  %v3698_v31 = vld [vmem:[%s6546_s3 + $0x520] sm:$0xf]  ;;  %v3706_v33 = vld [vmem:[%s6546_s3 + $0x528] sm:$0xf]  ;;  %v3002_v39 = vunpack.c.l.bf16 %v3001_v26 }
  0x13   :  { %v4268_v32 = vld [vmem:[%s6546_s3 + $0x65c] sm:$0xf0]  ;;  %v4269_v35 = vld [vmem:[%s6546_s3 + $0x664] sm:$0xf0]  ;;  %v4230_v36 = vld [vmem:[%s6546_s3 + $0x534] sm:$0xf] }
  0x14   :  { %v3716_v37 = vld [vmem:[%s6546_s3 + $0x670] sm:$0xf0]  ;;  %v3699_v41 = vor.u32 %v4268_v32, %v3698_v31  ;;  %v4147_v42 = vld [vmem:[%s6546_s3 + $0x29c] sm:$0xf]  ;;  %v3707_v44 = vor.u32 %v4269_v35, %v3706_v33  ;;  %v3378_v46 = vld [vmem:[%s6546_s3 + $0x2a0] sm:$0xf] }
  0x15   :  { %1599 = vmatpush.bf16.msrb.mxu2 %v3679_v56  ;;  %1612 = vmatpush.bf16.msrb.mxu3 %v3683_v60  ;;  %v3372_v43 = vld [vmem:[%s6546_s3 + $0x3d8] sm:$0xf0]  ;;  %v3719_v45 = vor.u32 %v4230_v36, %v3716_v37  ;;  %v4188_v47 = vld [vmem:[%s6546_s3 + $0x3dc] sm:$0xf0]  ;;  %v3386_v48 = vld [vmem:[%s6546_s3 + $0x2a8] sm:$0xf] }
  0x16   :  { %3019 = vmatpush.xpose.msk.msra.mxu0 %vm28_vm0, %v22_v5  ;;  %1587 = vmatpush.bf16.msrb.mxu1 %v3355_v38  ;;  %v4186_v5 = vld [vmem:[%s6546_s3 + $0x3cc] sm:$0xf0]  ;;  %v4189_v50 = vld [vmem:[%s6546_s3 + $0x3e4] sm:$0xf0]  ;;  %v4150_v51 = vld [vmem:[%s6546_s3 + $0x2b4] sm:$0xf]  ;;  %v3375_v54 = vor.u32 %v4147_v42, %v3372_v43  ;;  %v3379_v55 = vor.u32 %v4188_v47, %v3378_v46 }
  0x17   :  { %v3363_v8 = vor.u32 %v4186_v5, %v3362_v3  ;;  %v4067_v56 = vld [vmem:[%s6546_s3 + $0x1c] sm:$0xf]  ;;  %v3058_v58 = vld [vmem:[%s6546_s3 + $0x20] sm:$0xf]  ;;  %v3387_v59 = vor.u32 %v4189_v50, %v3386_v48  ;;  %v3066_v62 = vld [vmem:[%s6546_s3 + $0x28] sm:$0xf] }
  0x18   :  { %v3052_v57 = vld [vmem:[%s6546_s3 + $0x158] sm:$0xf0]  ;;  %v4109_v63 = vld [vmem:[%s6546_s3 + $0x164] sm:$0xf0]  ;;  %v4070_v1 = vld [vmem:[%s6546_s3 + $0x34] sm:$0xf] }
  0x19   :  { %1600 = vmatpush.bf16.msrb.mxu2 %v3359_v4  ;;  %1613 = vmatpush.bf16.msrb.mxu3 %v3363_v8  ;;  %v3076_v2 = vld [vmem:[%s6546_s3 + $0x170] sm:$0xf0]  ;;  %v3055_v3 = vor.u32 %v4067_v56, %v3052_v57  ;;  %v3067_v5 = vor.u32 %v4109_v63, %v3066_v62  ;;  %v3708_v8 = vld [vmem:[%s6546_s3 + $0x668] sm:$0xf0]  ;;  %v3394_v21 = vld [vmem:[%s6546_s3 + $0x2b0] sm:$0xf] }
  0x1a   :  { %3020 = vmatpush.xpose.msk.msra.mxu0 %vm28_vm0, %v21_v6  ;;  %1588 = vmatpush.bf16.msrb.mxu1 %v3035_v49  ;;  %v3370_v6 = vld [vmem:[%s6546_s3 + $0x298] sm:$0xf]  ;;  %v3412_v26 = vld [vmem:[%s6546_s3 + $0x400] sm:$0xf0]  ;;  %v3074_v33 = vld [vmem:[%s6546_s3 + $0x30] sm:$0xf] }
  0x1b   :  { %v3402_v23 = vld [vmem:[%s6546_s3 + $0x2b8] sm:$0xf]  ;;  %v4072_v37 = vld [vmem:[%s6546_s3 + $0x44] sm:$0xf]  ;;  %v3730_v46 = vld [vmem:[%s6546_s3 + $0x540] sm:$0xf] }
  0x1c   :  { %v3082_v35 = vld [vmem:[%s6546_s3 + $0x38] sm:$0xf]  ;;  %v4272_v47 = vld [vmem:[%s6546_s3 + $0x67c] sm:$0xf0]  ;;  %v3738_v48 = vld [vmem:[%s6546_s3 + $0x548] sm:$0xf] }
  0x1d   :  { %v4111_v36 = vld [vmem:[%s6546_s3 + $0x174] sm:$0xf0]  ;;  %v4234_v50 = vld [vmem:[%s6546_s3 + $0x554] sm:$0xf] }
  0x1e   :  { %3021 = vmatpush.xpose.msk.msra.mxu0 %vm28_vm0, %v20_v7  ;;  %v4187_v7 = vld [vmem:[%s6546_s3 + $0x3d4] sm:$0xf0]  ;;  %v3083_v42 = vor.u32 %v4111_v36, %v3082_v35  ;;  %v4154_v62 = vld [vmem:[%s6546_s3 + $0x2d4] sm:$0xf]  ;;  %v3444_v35 = vld [vmem:[%s6546_s3 + $0x420] sm:$0xf0] }
  0x1f   :  { %v3428_v63 = vld [vmem:[%s6546_s3 + $0x410] sm:$0xf0] }
  0x21   :  { %3022 = vmatmul.msk.f32.vlgmr.msra.gmra.mxu0 %vm28_vm0, %v19_v9  ;;  %v3371_v9 = vor.u32 %v4187_v7, %v3370_v6  ;;  %v3079_v6 = vor.u32 %v4070_v1, %v3076_v2  ;;  %v4229_v7 = vld [vmem:[%s6546_s3 + $0x52c] sm:$0xf]  ;;  %v4071_v2 = vld [vmem:[%s6546_s3 + $0x3c] sm:$0xf] }
  0x22   :  { %1625 = vmatpush.bf16.msrb.mxu0 %v3687_v29 }
  0x26   :  { %1626 = vmatpush.bf16.msrb.mxu0 %v3367_v40  ;;  %v3695_v40 = vor.u32 %v4227_v27, %v3692_v28 }
  0x2a   :  { %1627 = vmatpush.bf16.msrb.mxu0 %v3047_v52  ;;  %v3396_v52 = vld [vmem:[%s6546_s3 + $0x3f0] sm:$0xf0] }
  0x2b   :  { %v3399_v60 = vor.u32 %v4150_v51, %v3396_v52  ;;  %v3748_v51 = vld [vmem:[%s6546_s3 + $0x690] sm:$0xf0] }
  0x2c   :  { %v3751_v57 = vor.u32 %v4234_v50, %v3748_v51 }
  0x2e   :  { %1677 = vmatpush.bf16.msra.mxu0 %v3703_v0 }
  0x9e   :  { %v73_v10 = vpop.f32.mrf.mxu0 }
  0x9f   :  { %v77_v11 = vsel %vm76_vm1, %v73_v10, -inf }
  0xa0   :  { %78 = vmax.xlane.f32.xlu0 %v77_v11  ;;  %v3380_v11 = vld [vmem:[%s6546_s3 + $0x3e0] sm:$0xf0] }
 0x113   :  { %v79_v12 = vpop.xlane.xlu0 %78 }
 0x114   :  { %v80_v13 = vsub.f32 %v73_v10, %v79_v12  ;;  %v4148_v10 = vld [vmem:[%s6546_s3 + $0x2a4] sm:$0xf]  ;;  %v4065_v12 = vld [vmem:[%s6546_s3 + $0xc] sm:$0xf] }
 0x116   :  { %v81_v14 = vmul.f32 1.442695, %v80_v13  ;;  %v3383_v13 = vor.u32 %v4148_v10, %v3380_v11  ;;  %v4270_v10 = vld [vmem:[%s6546_s3 + $0x66c] sm:$0xf0]  ;;  %v3722_v11 = vld [vmem:[%s6546_s3 + $0x538] sm:$0xf] }
 0x118   :  { %4304 = vpow2.f32 %v81_v14  ;;  %v3036_v14 = vld [vmem:[%s6546_s3 + $0x148] sm:$0xf0]  ;;  %1678 = vmatpush.bf16.msra.mxu0 %v3383_v13  ;;  %v4232_v13 = vld [vmem:[%s6546_s3 + $0x544] sm:$0xf] }
 0x119   :  { %v3039_v17 = vor.u32 %v4065_v12, %v3036_v14  ;;  %v4271_v12 = vld [vmem:[%s6546_s3 + $0x674] sm:$0xf0]  ;;  %v3732_v14 = vld [vmem:[%s6546_s3 + $0x680] sm:$0xf0] }
 0x11a   :  { %v3723_v19 = vor.u32 %v4271_v12, %v3722_v11  ;;  %v3735_v20 = vor.u32 %v4232_v13, %v3732_v14  ;;  %v3108_v11 = vld [vmem:[%s6546_s3 + $0x190] sm:$0xf0] }
 0x11b   :  { %1601 = vmatpush.bf16.msrb.mxu2 %v3039_v17  ;;  %v4149_v17 = vld [vmem:[%s6546_s3 + $0x2ac] sm:$0xf] }
 0x11c   :  { %1679 = vmatpush.bf16.msra.mxu0 %v3063_v24  ;;  %v4191_v24 = vld [vmem:[%s6546_s3 + $0x3f4] sm:$0xf0] }
 0x11d   :  { %v3403_v31 = vor.u32 %v4191_v24, %v3402_v23  ;;  %v3764_v23 = vld [vmem:[%s6546_s3 + $0x6a0] sm:$0xf0] }
 0x11e   :  { %v4305_v15 = vpop.eup %4304 }
 0x11f   :  { %3023 = vmatmul.msk.f32.vlgmr.msra.gmra.mxu1 %vm76_vm1, %v4305_v15  ;;  %v83_v16 = vsel %vm76_vm1, %v4305_v15, 0.0  ;;  %v3042_v15 = vld [vmem:[%s6546_s3 + $0x10] sm:$0xf] }
 0x120   :  { %84 = vadd.xlane.f32.xlu0 %v83_v16  ;;  %1638 = vmatpush.bf16.msra.mxu1 %v3691_v61  ;;  %v4106_v16 = vld [vmem:[%s6546_s3 + $0x14c] sm:$0xf0]  ;;  %v4108_v61 = vld [vmem:[%s6546_s3 + $0x15c] sm:$0xf0] }
 0x121   :  { %v3043_v18 = vor.u32 %v4106_v16, %v3042_v15  ;;  %v3059_v4 = vor.u32 %v4108_v61, %v3058_v58  ;;  %v3711_v15 = vor.u32 %v4229_v7, %v3708_v8  ;;  %v3410_v58 = vld [vmem:[%s6546_s3 + $0x2c0] sm:$0xf]  ;;  %v4193_v61 = vld [vmem:[%s6546_s3 + $0x404] sm:$0xf0] }
 0x122   :  { %v4112_v7 = vld [vmem:[%s6546_s3 + $0x17c] sm:$0xf0]  ;;  %v3098_v8 = vld [vmem:[%s6546_s3 + $0x48] sm:$0xf] }
 0x123   :  { %1614 = vmatpush.bf16.msrb.mxu3 %v3043_v18  ;;  %v3388_v18 = vld [vmem:[%s6546_s3 + $0x3e8] sm:$0xf0] }
 0x124   :  { %1639 = vmatpush.bf16.msra.mxu1 %v3371_v9  ;;  %v3714_v9 = vld [vmem:[%s6546_s3 + $0x530] sm:$0xf]  ;;  %v3391_v27 = vor.u32 %v4149_v17, %v3388_v18  ;;  %v3740_v17 = vld [vmem:[%s6546_s3 + $0x688] sm:$0xf0] }
 0x125   :  { %v3715_v16 = vor.u32 %v4270_v10, %v3714_v9  ;;  %v4113_v9 = vld [vmem:[%s6546_s3 + $0x184] sm:$0xf0]  ;;  %v4074_v10 = vld [vmem:[%s6546_s3 + $0x54] sm:$0xf]  ;;  %v3746_v18 = vld [vmem:[%s6546_s3 + $0x550] sm:$0xf] }
 0x126   :  { %v3099_v14 = vor.u32 %v4113_v9, %v3098_v8  ;;  %v3460_v8 = vld [vmem:[%s6546_s3 + $0x430] sm:$0xf0] }
 0x128   :  { %1640 = vmatpush.bf16.msra.mxu1 %v3051_v22  ;;  %v4190_v22 = vld [vmem:[%s6546_s3 + $0x3ec] sm:$0xf0] }
 0x129   :  { %v3395_v28 = vor.u32 %v4190_v22, %v3394_v21  ;;  %v4275_v21 = vld [vmem:[%s6546_s3 + $0x694] sm:$0xf0]  ;;  %v4236_v22 = vld [vmem:[%s6546_s3 + $0x564] sm:$0xf] }
 0x193   :  { %v85_v25 = vpop.xlane.xlu0 %84 }
 0x194   :  { %4306 = vrcp.f32 %v85_v25  ;;  %v4152_v25 = vld [vmem:[%s6546_s3 + $0x2c4] sm:$0xf] }
 0x195   :  { %v3415_v32 = vor.u32 %v4152_v25, %v3412_v26  ;;  %v4153_v26 = vld [vmem:[%s6546_s3 + $0x2cc] sm:$0xf] }
 0x19a   :  { %v4307_v29 = vpop.eup %4306 }
 0x19c   :  { %v106_v30 = vpop.f32.mrf.mxu1 }
 0x19d   :  { %v110_v34 = vmul.f32 %v4307_v29, %v106_v30  ;;  %v4069_v29 = vld [vmem:[%s6546_s3 + $0x2c] sm:$0xf] }
 0x19e   :  { %v3068_v30 = vld [vmem:[%s6546_s3 + $0x168] sm:$0xf0] }
 0x19f   :  { %v4702_v38 = vpack.c.bf16 %v110_v34, %v110_v34  ;;  %v4110_v34 = vld [vmem:[%s6546_s3 + $0x16c] sm:$0xf0] }
 0x1a1   :  { %3984 = vmatmul.msk.bf16.vlgmr.msra.gmra.mxu2 %vm28_vm0, %v4702_v38  ;;  %3985 = vmatmul.msk.bf16.vlgmr.msra.gmra.mxu3 %vm28_vm0, %v4702_v38  ;;  %v3000_v49 = vunpack.c.l.bf16 %v4702_v38 }
 0x1a2   :  { %3986 = vmatmul.msk.bf16.vlgmr.msrb.gmra.mxu1 %vm28_vm0, %v4702_v38  ;;  %3989 = vmatmul.msk.bf16.vlgmr.msrb.gmra.mxu0 %vm28_vm0, %v4702_v38 }
 0x1a3   :  { %v3003_v53 = vmul.f32 %v3002_v39, %v3000_v49  ;;  %1651 = vmatpush.bf16.msra.mxu2 %v3695_v40  ;;  %1664 = vmatpush.bf16.msra.mxu3 %v3699_v41  ;;  %v3092_v39 = vld [vmem:[%s6546_s3 + $0x180] sm:$0xf0]  ;;  %v3071_v40 = vor.u32 %v4069_v29, %v3068_v30  ;;  %v3075_v41 = vor.u32 %v4110_v34, %v3074_v33  ;;  %v4273_v49 = vld [vmem:[%s6546_s3 + $0x684] sm:$0xf0]  ;;  %v3426_v30 = vld [vmem:[%s6546_s3 + $0x2d0] sm:$0xf] }
 0x1a4   :  { %1690 = vmatpush.bf16.msrb.mxu1 %v3707_v44  ;;  %1729 = vmatpush.bf16.msrb.mxu0 %v3719_v45  ;;  %v3095_v43 = vor.u32 %v4072_v37, %v3092_v39  ;;  %v4231_v44 = vld [vmem:[%s6546_s3 + $0x53c] sm:$0xf]  ;;  %v3739_v56 = vor.u32 %v4273_v49, %v3738_v48  ;;  %v3767_v29 = vor.u32 %v4236_v22, %v3764_v23  ;;  %v4195_v33 = vld [vmem:[%s6546_s3 + $0x414] sm:$0xf0]  ;;  %v4156_v34 = vld [vmem:[%s6546_s3 + $0x2e4] sm:$0xf] }
 0x1a5   :  { %v3004_v0 = vsel %vm28_vm0, %v3003_v53, 0.0  ;;  %v3724_v45 = vld [vmem:[%s6546_s3 + $0x678] sm:$0xf0]  ;;  %v3731_v53 = vor.u32 %v4272_v47, %v3730_v46  ;;  %v4073_v39 = vld [vmem:[%s6546_s3 + $0x4c] sm:$0xf] }
 0x1a6   :  { %3005 = vadd.xlane.f32.xlu2 %v3004_v0  ;;  %v3727_v52 = vor.u32 %v4231_v44, %v3724_v45  ;;  %v4114_v44 = vld [vmem:[%s6546_s3 + $0x18c] sm:$0xf0]  ;;  %v3114_v45 = vld [vmem:[%s6546_s3 + $0x58] sm:$0xf]  ;;  %v4076_v47 = vld [vmem:[%s6546_s3 + $0x64] sm:$0xf] }
 0x1a7   :  { %1652 = vmatpush.bf16.msra.mxu2 %v3375_v54  ;;  %1665 = vmatpush.bf16.msra.mxu3 %v3379_v55  ;;  %v4151_v54 = vld [vmem:[%s6546_s3 + $0x2bc] sm:$0xf]  ;;  %v4115_v46 = vld [vmem:[%s6546_s3 + $0x194] sm:$0xf0]  ;;  %v3124_v48 = vld [vmem:[%s6546_s3 + $0x1a0] sm:$0xf0] }
 0x1a8   :  { %1691 = vmatpush.bf16.msrb.mxu1 %v3387_v59  ;;  %1730 = vmatpush.bf16.msrb.mxu0 %v3399_v60  ;;  %v3404_v55 = vld [vmem:[%s6546_s3 + $0x3f8] sm:$0xf0]  ;;  %v4192_v59 = vld [vmem:[%s6546_s3 + $0x3fc] sm:$0xf0]  ;;  %v3418_v60 = vld [vmem:[%s6546_s3 + $0x2c8] sm:$0xf]  ;;  %v3115_v51 = vor.u32 %v4115_v46, %v3114_v45 }
 0x1a9   :  { %v3407_v0 = vor.u32 %v4151_v54, %v3404_v55  ;;  %v3411_v1 = vor.u32 %v4192_v59, %v3410_v58  ;;  %v3756_v54 = vld [vmem:[%s6546_s3 + $0x698] sm:$0xf0]  ;;  %v3762_v55 = vld [vmem:[%s6546_s3 + $0x560] sm:$0xf]  ;;  %v4277_v58 = vld [vmem:[%s6546_s3 + $0x6a4] sm:$0xf0] }
 0x1aa   :  { %v4238_v59 = vld [vmem:[%s6546_s3 + $0x574] sm:$0xf]  ;;  %v3476_v45 = vld [vmem:[%s6546_s3 + $0x440] sm:$0xf0] }
 0x1ab   :  { %1653 = vmatpush.bf16.msra.mxu2 %v3055_v3  ;;  %1666 = vmatpush.bf16.msra.mxu3 %v3059_v4  ;;  %v3084_v3 = vld [vmem:[%s6546_s3 + $0x178] sm:$0xf0]  ;;  %v3419_v4 = vor.u32 %v4193_v61, %v3418_v60  ;;  %v3780_v60 = vld [vmem:[%s6546_s3 + $0x6b0] sm:$0xf0] }
 0x1ac   :  { %1692 = vmatpush.bf16.msrb.mxu1 %v3067_v5  ;;  %1731 = vmatpush.bf16.msrb.mxu0 %v3079_v6  ;;  %v3431_v5 = vor.u32 %v4154_v62, %v3428_v63  ;;  %v3090_v6 = vld [vmem:[%s6546_s3 + $0x40] sm:$0xf]  ;;  %v3087_v12 = vor.u32 %v4071_v2, %v3084_v3  ;;  %v4155_v63 = vld [vmem:[%s6546_s3 + $0x2dc] sm:$0xf]  ;;  %v3783_v2 = vor.u32 %v4238_v59, %v3780_v60 }
 0x1ad   :  { %v3091_v13 = vor.u32 %v4112_v7, %v3090_v6  ;;  %v3442_v3 = vld [vmem:[%s6546_s3 + $0x2e0] sm:$0xf]  ;;  %v4197_v6 = vld [vmem:[%s6546_s3 + $0x424] sm:$0xf0]  ;;  %v4158_v7 = vld [vmem:[%s6546_s3 + $0x2f4] sm:$0xf] }
 0x1b1   :  { %3987 = vmatmul.msk.bf16.vlgmr.msrb.gmra.mxu2 %vm28_vm0, %v4702_v38  ;;  %3988 = vmatmul.msk.bf16.vlgmr.msrb.gmra.mxu3 %vm28_vm0, %v4702_v38 }
 0x1b2   :  { %3990 = vmatmul.msk.bf16.vlgmr.msra.gmra.mxu1 %vm28_vm0, %v4702_v38  ;;  %3993 = vmatmul.msk.bf16.vlgmr.msra.gmra.mxu0 %vm28_vm0, %v4702_v38 }
 0x1b3   :  { %1703 = vmatpush.bf16.msrb.mxu2 %v3711_v15  ;;  %1716 = vmatpush.bf16.msrb.mxu3 %v3715_v16  ;;  %v3111_v15 = vor.u32 %v4074_v10, %v3108_v11  ;;  %v4233_v16 = vld [vmem:[%s6546_s3 + $0x54c] sm:$0xf]  ;;  %v4075_v11 = vld [vmem:[%s6546_s3 + $0x5c] sm:$0xf] }
 0x1b4   :  { %1742 = vmatpush.bf16.msra.mxu1 %v3723_v19  ;;  %1781 = vmatpush.bf16.msra.mxu0 %v3735_v20  ;;  %v4274_v19 = vld [vmem:[%s6546_s3 + $0x68c] sm:$0xf0]  ;;  %v3754_v20 = vld [vmem:[%s6546_s3 + $0x558] sm:$0xf]  ;;  %v3743_v24 = vor.u32 %v4233_v16, %v3740_v17  ;;  %v4116_v16 = vld [vmem:[%s6546_s3 + $0x19c] sm:$0xf0] }
 0x1b5   :  { %v3747_v25 = vor.u32 %v4274_v19, %v3746_v18  ;;  %v3130_v17 = vld [vmem:[%s6546_s3 + $0x68] sm:$0xf]  ;;  %v4078_v19 = vld [vmem:[%s6546_s3 + $0x74] sm:$0xf] }
 0x1b6   :  { %v4117_v18 = vld [vmem:[%s6546_s3 + $0x1a4] sm:$0xf0] }
 0x1b7   :  { %1704 = vmatpush.bf16.msrb.mxu2 %v3391_v27  ;;  %1717 = vmatpush.bf16.msrb.mxu3 %v3395_v28  ;;  %v3420_v27 = vld [vmem:[%s6546_s3 + $0x408] sm:$0xf0]  ;;  %v3755_v28 = vor.u32 %v4275_v21, %v3754_v20  ;;  %v3140_v20 = vld [vmem:[%s6546_s3 + $0x1b0] sm:$0xf0]  ;;  %v3131_v23 = vor.u32 %v4117_v18, %v3130_v17 }
 0x1b8   :  { %1743 = vmatpush.bf16.msra.mxu1 %v3403_v31  ;;  %1782 = vmatpush.bf16.msra.mxu0 %v3415_v32  ;;  %v4194_v31 = vld [vmem:[%s6546_s3 + $0x40c] sm:$0xf0]  ;;  %v3434_v32 = vld [vmem:[%s6546_s3 + $0x2d8] sm:$0xf]  ;;  %v3423_v36 = vor.u32 %v4153_v26, %v3420_v27  ;;  %v3772_v26 = vld [vmem:[%s6546_s3 + $0x6a8] sm:$0xf0] }
 0x1b9   :  { %v3427_v37 = vor.u32 %v4194_v31, %v3426_v30  ;;  %v3778_v27 = vld [vmem:[%s6546_s3 + $0x570] sm:$0xf]  ;;  %v4279_v30 = vld [vmem:[%s6546_s3 + $0x6b4] sm:$0xf0]  ;;  %v4240_v31 = vld [vmem:[%s6546_s3 + $0x584] sm:$0xf] }
 0x1ba   :  { %v3492_v17 = vld [vmem:[%s6546_s3 + $0x450] sm:$0xf0] }
 0x1bb   :  { %1705 = vmatpush.bf16.msrb.mxu2 %v3071_v40  ;;  %1718 = vmatpush.bf16.msrb.mxu3 %v3075_v41  ;;  %v3100_v40 = vld [vmem:[%s6546_s3 + $0x188] sm:$0xf0]  ;;  %v3435_v41 = vor.u32 %v4195_v33, %v3434_v32  ;;  %v3796_v32 = vld [vmem:[%s6546_s3 + $0x6c0] sm:$0xf0] }
 0x1bc   :  { %1744 = vmatpush.bf16.msra.mxu1 %v3083_v42  ;;  %1783 = vmatpush.bf16.msra.mxu0 %v3095_v43  ;;  %v3447_v42 = vor.u32 %v4156_v34, %v3444_v35  ;;  %v3106_v43 = vld [vmem:[%s6546_s3 + $0x50] sm:$0xf]  ;;  %v3103_v49 = vor.u32 %v4073_v39, %v3100_v40  ;;  %v4157_v35 = vld [vmem:[%s6546_s3 + $0x2ec] sm:$0xf]  ;;  %v3799_v39 = vor.u32 %v4240_v31, %v3796_v32 }
 0x1bd   :  { %v3107_v50 = vor.u32 %v4114_v44, %v3106_v43  ;;  %v3458_v40 = vld [vmem:[%s6546_s3 + $0x2f0] sm:$0xf]  ;;  %v4199_v43 = vld [vmem:[%s6546_s3 + $0x434] sm:$0xf0]  ;;  %v4160_v44 = vld [vmem:[%s6546_s3 + $0x304] sm:$0xf] }
 0x1c1   :  { %3991 = vmatmul.msk.bf16.vlgmr.msra.gmra.mxu2 %vm28_vm0, %v4702_v38  ;;  %3992 = vmatmul.msk.bf16.vlgmr.msra.gmra.mxu3 %vm28_vm0, %v4702_v38 }
 0x1c2   :  { %3994 = vmatmul.msk.bf16.vlgmr.msrb.gmra.mxu1 %vm28_vm0, %v4702_v38  ;;  %3997 = vmatmul.msk.bf16.vlgmr.msrb.gmra.mxu0 %vm28_vm0, %v4702_v38 }
 0x1c3   :  { %1755 = vmatpush.bf16.msra.mxu2 %v3727_v52  ;;  %1768 = vmatpush.bf16.msra.mxu3 %v3731_v53  ;;  %v3127_v52 = vor.u32 %v4076_v47, %v3124_v48  ;;  %v4235_v53 = vld [vmem:[%s6546_s3 + $0x55c] sm:$0xf]  ;;  %v4077_v48 = vld [vmem:[%s6546_s3 + $0x6c] sm:$0xf] }
 0x1c4   :  { %1794 = vmatpush.bf16.msrb.mxu1 %v3739_v56  ;;  %1833 = vmatpush.bf16.msrb.mxu0 %v3751_v57  ;;  %v4276_v56 = vld [vmem:[%s6546_s3 + $0x69c] sm:$0xf0]  ;;  %v3770_v57 = vld [vmem:[%s6546_s3 + $0x568] sm:$0xf]  ;;  %v3759_v61 = vor.u32 %v4235_v53, %v3756_v54  ;;  %v4118_v53 = vld [vmem:[%s6546_s3 + $0x1ac] sm:$0xf0] }
 0x1c5   :  { %v3763_v62 = vor.u32 %v4276_v56, %v3762_v55  ;;  %v3146_v54 = vld [vmem:[%s6546_s3 + $0x78] sm:$0xf]  ;;  %v4080_v56 = vld [vmem:[%s6546_s3 + $0x84] sm:$0xf] }
 0x1c6   :  { %v4119_v55 = vld [vmem:[%s6546_s3 + $0x1b4] sm:$0xf0] }
 0x1c7   :  { %1756 = vmatpush.bf16.msra.mxu2 %v3407_v0  ;;  %1769 = vmatpush.bf16.msra.mxu3 %v3411_v1  ;;  %v3436_v0 = vld [vmem:[%s6546_s3 + $0x418] sm:$0xf0]  ;;  %v3771_v1 = vor.u32 %v4277_v58, %v3770_v57  ;;  %v3156_v57 = vld [vmem:[%s6546_s3 + $0x1c0] sm:$0xf0]  ;;  %v3147_v60 = vor.u32 %v4119_v55, %v3146_v54 }
 0x1c8   :  { %1795 = vmatpush.bf16.msrb.mxu1 %v3419_v4  ;;  %1834 = vmatpush.bf16.msrb.mxu0 %v3431_v5  ;;  %v4196_v4 = vld [vmem:[%s6546_s3 + $0x41c] sm:$0xf0]  ;;  %v3450_v5 = vld [vmem:[%s6546_s3 + $0x2e8] sm:$0xf]  ;;  %v3439_v9 = vor.u32 %v4155_v63, %v3436_v0  ;;  %v3788_v63 = vld [vmem:[%s6546_s3 + $0x6b8] sm:$0xf0] }
 0x1c9   :  { %v3443_v10 = vor.u32 %v4196_v4, %v3442_v3  ;;  %v3794_v0 = vld [vmem:[%s6546_s3 + $0x580] sm:$0xf]  ;;  %v4281_v3 = vld [vmem:[%s6546_s3 + $0x6c4] sm:$0xf0]  ;;  %v4242_v4 = vld [vmem:[%s6546_s3 + $0x594] sm:$0xf] }
 0x1ca   :  { %v3508_v54 = vld [vmem:[%s6546_s3 + $0x460] sm:$0xf0] }
 0x1cb   :  { %1757 = vmatpush.bf16.msra.mxu2 %v3087_v12  ;;  %1770 = vmatpush.bf16.msra.mxu3 %v3091_v13  ;;  %v3116_v12 = vld [vmem:[%s6546_s3 + $0x198] sm:$0xf0]  ;;  %v3451_v13 = vor.u32 %v4197_v6, %v3450_v5  ;;  %v3812_v5 = vld [vmem:[%s6546_s3 + $0x6d0] sm:$0xf0] }
 0x1cc   :  { %1796 = vmatpush.bf16.msrb.mxu1 %v3099_v14  ;;  %1835 = vmatpush.bf16.msrb.mxu0 %v3111_v15  ;;  %v3463_v14 = vor.u32 %v4158_v7, %v3460_v8  ;;  %v3122_v15 = vld [vmem:[%s6546_s3 + $0x60] sm:$0xf]  ;;  %v3119_v21 = vor.u32 %v4075_v11, %v3116_v12  ;;  %v4159_v8 = vld [vmem:[%s6546_s3 + $0x2fc] sm:$0xf]  ;;  %v3815_v11 = vor.u32 %v4242_v4, %v3812_v5 }
 0x1cd   :  { %v3123_v22 = vor.u32 %v4116_v16, %v3122_v15  ;;  %v3474_v12 = vld [vmem:[%s6546_s3 + $0x300] sm:$0xf]  ;;  %v4201_v15 = vld [vmem:[%s6546_s3 + $0x444] sm:$0xf0]  ;;  %v4162_v16 = vld [vmem:[%s6546_s3 + $0x314] sm:$0xf] }
 0x1d1   :  { %3995 = vmatmul.msk.bf16.vlgmr.msrb.gmra.mxu2 %vm28_vm0, %v4702_v38  ;;  %3996 = vmatmul.msk.bf16.vlgmr.msrb.gmra.mxu3 %vm28_vm0, %v4702_v38 }
 0x1d2   :  { %3998 = vmatmul.msk.bf16.vlgmr.msra.gmra.mxu1 %vm28_vm0, %v4702_v38  ;;  %4001 = vmatmul.msk.bf16.vlgmr.msra.gmra.mxu0 %vm28_vm0, %v4702_v38 }
 0x1d3   :  { %1807 = vmatpush.bf16.msrb.mxu2 %v3743_v24  ;;  %1820 = vmatpush.bf16.msrb.mxu3 %v3747_v25  ;;  %v3143_v24 = vor.u32 %v4078_v19, %v3140_v20  ;;  %v4237_v25 = vld [vmem:[%s6546_s3 + $0x56c] sm:$0xf]  ;;  %v4079_v20 = vld [vmem:[%s6546_s3 + $0x7c] sm:$0xf] }
 0x1d4   :  { %1846 = vmatpush.bf16.msra.mxu1 %v3755_v28  ;;  %1885 = vmatpush.bf16.msra.mxu0 %v3767_v29  ;;  %v4278_v28 = vld [vmem:[%s6546_s3 + $0x6ac] sm:$0xf0]  ;;  %v3786_v29 = vld [vmem:[%s6546_s3 + $0x578] sm:$0xf]  ;;  %v3775_v33 = vor.u32 %v4237_v25, %v3772_v26  ;;  %v4120_v25 = vld [vmem:[%s6546_s3 + $0x1bc] sm:$0xf0] }
 0x1d5   :  { %v3779_v34 = vor.u32 %v4278_v28, %v3778_v27  ;;  %v3162_v26 = vld [vmem:[%s6546_s3 + $0x88] sm:$0xf]  ;;  %v4082_v28 = vld [vmem:[%s6546_s3 + $0x94] sm:$0xf] }
 0x1d6   :  { %v4121_v27 = vld [vmem:[%s6546_s3 + $0x1c4] sm:$0xf0] }
 0x1d7   :  { %1808 = vmatpush.bf16.msrb.mxu2 %v3423_v36  ;;  %1821 = vmatpush.bf16.msrb.mxu3 %v3427_v37  ;;  %v3452_v36 = vld [vmem:[%s6546_s3 + $0x428] sm:$0xf0]  ;;  %v3787_v37 = vor.u32 %v4279_v30, %v3786_v29  ;;  %v3172_v29 = vld [vmem:[%s6546_s3 + $0x1d0] sm:$0xf0]  ;;  %v3163_v32 = vor.u32 %v4121_v27, %v3162_v26  ;;  %v4205_v26 = vld [vmem:[%s6546_s3 + $0x464] sm:$0xf0] }
 0x1d8   :  { %1847 = vmatpush.bf16.msra.mxu1 %v3435_v41  ;;  %1886 = vmatpush.bf16.msra.mxu0 %v3447_v42  ;;  %v4198_v41 = vld [vmem:[%s6546_s3 + $0x42c] sm:$0xf0]  ;;  %v3466_v42 = vld [vmem:[%s6546_s3 + $0x2f8] sm:$0xf]  ;;  %v3455_v46 = vor.u32 %v4157_v35, %v3452_v36  ;;  %v3804_v35 = vld [vmem:[%s6546_s3 + $0x6c8] sm:$0xf0] }
 0x1d9   :  { %v3459_v47 = vor.u32 %v4198_v41, %v3458_v40  ;;  %v3810_v36 = vld [vmem:[%s6546_s3 + $0x590] sm:$0xf]  ;;  %v4283_v40 = vld [vmem:[%s6546_s3 + $0x6d4] sm:$0xf0]  ;;  %v4244_v41 = vld [vmem:[%s6546_s3 + $0x5a4] sm:$0xf] }
 0x1da   :  { %v4166_v27 = vld [vmem:[%s6546_s3 + $0x334] sm:$0xf] }
 0x1db   :  { %1809 = vmatpush.bf16.msrb.mxu2 %v3103_v49  ;;  %1822 = vmatpush.bf16.msrb.mxu3 %v3107_v50  ;;  %v3132_v49 = vld [vmem:[%s6546_s3 + $0x1a8] sm:$0xf0]  ;;  %v3467_v50 = vor.u32 %v4199_v43, %v3466_v42  ;;  %v3828_v42 = vld [vmem:[%s6546_s3 + $0x6e0] sm:$0xf0] }
 0x1dc   :  { %1848 = vmatpush.bf16.msra.mxu1 %v3115_v51  ;;  %1887 = vmatpush.bf16.msra.mxu0 %v3127_v52  ;;  %v3479_v51 = vor.u32 %v4160_v44, %v3476_v45  ;;  %v3138_v52 = vld [vmem:[%s6546_s3 + $0x70] sm:$0xf]  ;;  %v3135_v58 = vor.u32 %v4077_v48, %v3132_v49  ;;  %v4161_v45 = vld [vmem:[%s6546_s3 + $0x30c] sm:$0xf]  ;;  %v3831_v48 = vor.u32 %v4244_v41, %v3828_v42  ;;  %v4125_v41 = vld [vmem:[%s6546_s3 + $0x1e4] sm:$0xf0] }
 0x1dd   :  { %v3139_v59 = vor.u32 %v4118_v53, %v3138_v52  ;;  %v3490_v49 = vld [vmem:[%s6546_s3 + $0x310] sm:$0xf]  ;;  %v4203_v52 = vld [vmem:[%s6546_s3 + $0x454] sm:$0xf0]  ;;  %v4164_v53 = vld [vmem:[%s6546_s3 + $0x324] sm:$0xf] }
 0x1de   :  { %v4086_v42 = vld [vmem:[%s6546_s3 + $0xb4] sm:$0xf] }
 0x1e1   :  { %3999 = vmatmul.msk.bf16.vlgmr.msra.gmra.mxu2 %vm28_vm0, %v4702_v38  ;;  %4000 = vmatmul.msk.bf16.vlgmr.msra.gmra.mxu3 %vm28_vm0, %v4702_v38 }
 0x1e2   :  { %4002 = vmatmul.msk.bf16.vlgmr.msrb.gmra.mxu1 %vm28_vm0, %v4702_v38  ;;  %4005 = vmatmul.msk.bf16.vlgmr.msrb.gmra.mxu0 %vm28_vm0, %v4702_v38 }
 0x1e3   :  { %1859 = vmatpush.bf16.msra.mxu2 %v3759_v61  ;;  %1872 = vmatpush.bf16.msra.mxu3 %v3763_v62  ;;  %v3159_v61 = vor.u32 %v4080_v56, %v3156_v57  ;;  %v4239_v62 = vld [vmem:[%s6546_s3 + $0x57c] sm:$0xf]  ;;  %v4081_v57 = vld [vmem:[%s6546_s3 + $0x8c] sm:$0xf] }
 0x1e4   :  { %1898 = vmatpush.bf16.msrb.mxu1 %v3771_v1  ;;  %1937 = vmatpush.bf16.msrb.mxu0 %v3783_v2  ;;  %v4280_v1 = vld [vmem:[%s6546_s3 + $0x6bc] sm:$0xf0]  ;;  %v3802_v2 = vld [vmem:[%s6546_s3 + $0x588] sm:$0xf]  ;;  %v3791_v6 = vor.u32 %v4239_v62, %v3788_v63  ;;  %v4122_v62 = vld [vmem:[%s6546_s3 + $0x1cc] sm:$0xf0] }
 0x1e5   :  { %v3795_v7 = vor.u32 %v4280_v1, %v3794_v0  ;;  %v3178_v63 = vld [vmem:[%s6546_s3 + $0x98] sm:$0xf]  ;;  %v4084_v1 = vld [vmem:[%s6546_s3 + $0xa4] sm:$0xf] }
 0x1e6   :  { %v4123_v0 = vld [vmem:[%s6546_s3 + $0x1d4] sm:$0xf0] }
 0x1e7   :  { %1860 = vmatpush.bf16.msra.mxu2 %v3439_v9  ;;  %1873 = vmatpush.bf16.msra.mxu3 %v3443_v10  ;;  %v3468_v9 = vld [vmem:[%s6546_s3 + $0x438] sm:$0xf0]  ;;  %v3803_v10 = vor.u32 %v4281_v3, %v3802_v2  ;;  %v3188_v2 = vld [vmem:[%s6546_s3 + $0x1e0] sm:$0xf0]  ;;  %v3179_v5 = vor.u32 %v4123_v0, %v3178_v63  ;;  %v4165_v0 = vld [vmem:[%s6546_s3 + $0x32c] sm:$0xf] }
 0x1e8   :  { %1899 = vmatpush.bf16.msrb.mxu1 %v3451_v13  ;;  %1938 = vmatpush.bf16.msrb.mxu0 %v3463_v14  ;;  %v4200_v13 = vld [vmem:[%s6546_s3 + $0x43c] sm:$0xf0]  ;;  %v3482_v14 = vld [vmem:[%s6546_s3 + $0x308] sm:$0xf]  ;;  %v3471_v18 = vor.u32 %v4159_v8, %v3468_v9  ;;  %v3820_v8 = vld [vmem:[%s6546_s3 + $0x6d8] sm:$0xf0] }
 0x1e9   :  { %v3475_v19 = vor.u32 %v4200_v13, %v3474_v12  ;;  %v3826_v9 = vld [vmem:[%s6546_s3 + $0x5a0] sm:$0xf]  ;;  %v4285_v12 = vld [vmem:[%s6546_s3 + $0x6e4] sm:$0xf0]  ;;  %v4246_v13 = vld [vmem:[%s6546_s3 + $0x5b4] sm:$0xf] }
 0x1eb   :  { %1861 = vmatpush.bf16.msra.mxu2 %v3119_v21  ;;  %1874 = vmatpush.bf16.msra.mxu3 %v3123_v22  ;;  %v3148_v21 = vld [vmem:[%s6546_s3 + $0x1b8] sm:$0xf0]  ;;  %v3483_v22 = vor.u32 %v4201_v15, %v3482_v14  ;;  %v3844_v14 = vld [vmem:[%s6546_s3 + $0x6f0] sm:$0xf0] }
 0x1ec   :  { %1900 = vmatpush.bf16.msrb.mxu1 %v3131_v23  ;;  %1939 = vmatpush.bf16.msrb.mxu0 %v3143_v24  ;;  %v3495_v23 = vor.u32 %v4162_v16, %v3492_v17  ;;  %v3154_v24 = vld [vmem:[%s6546_s3 + $0x80] sm:$0xf]  ;;  %v3151_v30 = vor.u32 %v4079_v20, %v3148_v21  ;;  %v3500_v20 = vld [vmem:[%s6546_s3 + $0x458] sm:$0xf0] }
 0x1ed   :  { %v3155_v31 = vor.u32 %v4120_v25, %v3154_v24  ;;  %v4204_v24 = vld [vmem:[%s6546_s3 + $0x45c] sm:$0xf0]  ;;  %v3514_v25 = vld [vmem:[%s6546_s3 + $0x328] sm:$0xf] }
 0x1f1   :  { %4003 = vmatmul.msk.bf16.vlgmr.msrb.gmra.mxu2 %vm28_vm0, %v4702_v38  ;;  %4004 = vmatmul.msk.bf16.vlgmr.msrb.gmra.mxu3 %vm28_vm0, %v4702_v38 }
 0x1f2   :  { %4006 = vmatmul.msk.bf16.vlgmr.msra.gmra.mxu1 %vm28_vm0, %v4702_v38  ;;  %4009 = vmatmul.msk.bf16.vlgmr.msra.gmra.mxu0 %vm28_vm0, %v4702_v38 }
 0x1f3   :  { %1911 = vmatpush.bf16.msrb.mxu2 %v3775_v33  ;;  %1924 = vmatpush.bf16.msrb.mxu3 %v3779_v34  ;;  %v3175_v33 = vor.u32 %v4082_v28, %v3172_v29  ;;  %v4241_v34 = vld [vmem:[%s6546_s3 + $0x58c] sm:$0xf]  ;;  %v3524_v28 = vld [vmem:[%s6546_s3 + $0x470] sm:$0xf0] }
 0x1f4   :  { %1950 = vmatpush.bf16.msra.mxu1 %v3787_v37  ;;  %1989 = vmatpush.bf16.msra.mxu0 %v3799_v39  ;;  %v4282_v37 = vld [vmem:[%s6546_s3 + $0x6cc] sm:$0xf0]  ;;  %v3818_v39 = vld [vmem:[%s6546_s3 + $0x598] sm:$0xf]  ;;  %v3807_v43 = vor.u32 %v4241_v34, %v3804_v35  ;;  %v3515_v35 = vor.u32 %v4205_v26, %v3514_v25  ;;  %v3220_v25 = vld [vmem:[%s6546_s3 + $0x200] sm:$0xf0] }
 0x1f5   :  { %v3811_v44 = vor.u32 %v4282_v37, %v3810_v36  ;;  %v3527_v36 = vor.u32 %v4166_v27, %v3524_v28  ;;  %v3186_v37 = vld [vmem:[%s6546_s3 + $0xa0] sm:$0xf] }
 0x1f7   :  { %1912 = vmatpush.bf16.msrb.mxu2 %v3455_v46  ;;  %1925 = vmatpush.bf16.msrb.mxu3 %v3459_v47  ;;  %v3484_v46 = vld [vmem:[%s6546_s3 + $0x448] sm:$0xf0]  ;;  %v3819_v47 = vor.u32 %v4283_v40, %v3818_v39  ;;  %v4124_v39 = vld [vmem:[%s6546_s3 + $0x1dc] sm:$0xf0]  ;;  %v3194_v40 = vld [vmem:[%s6546_s3 + $0xa8] sm:$0xf] }
 0x1f8   :  { %1951 = vmatpush.bf16.msra.mxu1 %v3467_v50  ;;  %1990 = vmatpush.bf16.msra.mxu0 %v3479_v51  ;;  %v4202_v50 = vld [vmem:[%s6546_s3 + $0x44c] sm:$0xf0]  ;;  %v3498_v51 = vld [vmem:[%s6546_s3 + $0x318] sm:$0xf]  ;;  %v3487_v55 = vor.u32 %v4161_v45, %v3484_v46 }
 0x1f9   :  { %v3491_v56 = vor.u32 %v4202_v50, %v3490_v49  ;;  %v4245_v50 = vld [vmem:[%s6546_s3 + $0x5ac] sm:$0xf] }
 0x1fb   :  { %1913 = vmatpush.bf16.msrb.mxu2 %v3135_v58  ;;  %1926 = vmatpush.bf16.msrb.mxu3 %v3139_v59  ;;  %v3164_v58 = vld [vmem:[%s6546_s3 + $0x1c8] sm:$0xf0]  ;;  %v3499_v59 = vor.u32 %v4203_v52, %v3498_v51 }
 0x1fc   :  { %1952 = vmatpush.bf16.msra.mxu1 %v3147_v60  ;;  %1991 = vmatpush.bf16.msra.mxu0 %v3159_v61  ;;  %v3511_v60 = vor.u32 %v4164_v53, %v3508_v54  ;;  %v3170_v61 = vld [vmem:[%s6546_s3 + $0x90] sm:$0xf]  ;;  %v3167_v3 = vor.u32 %v4081_v57, %v3164_v58  ;;  %v3836_v51 = vld [vmem:[%s6546_s3 + $0x6e8] sm:$0xf0]  ;;  %v4287_v57 = vld [vmem:[%s6546_s3 + $0x6f4] sm:$0xf0] }
 0x1fd   :  { %v3171_v4 = vor.u32 %v4122_v62, %v3170_v61  ;;  %v3842_v54 = vld [vmem:[%s6546_s3 + $0x5b0] sm:$0xf]  ;;  %v4248_v58 = vld [vmem:[%s6546_s3 + $0x5c4] sm:$0xf]  ;;  %v3839_v62 = vor.u32 %v4245_v50, %v3836_v51  ;;  %v3532_v50 = vld [vmem:[%s6546_s3 + $0x478] sm:$0xf0] }
 0x201   :  { %4007 = vmatmul.msk.bf16.vlgmr.msra.gmra.mxu2 %vm28_vm0, %v4702_v38  ;;  %4008 = vmatmul.msk.bf16.vlgmr.msra.gmra.mxu3 %vm28_vm0, %v4702_v38 }
 0x202   :  { %4010 = vmatmul.msk.bf16.vlgmr.msrb.gmra.mxu1 %vm28_vm0, %v4702_v38  ;;  %4013 = vmatmul.msk.bf16.vlgmr.msrb.gmra.mxu0 %vm28_vm0, %v4702_v38 }
 0x203   :  { %1963 = vmatpush.bf16.msra.mxu2 %v3791_v6  ;;  %1976 = vmatpush.bf16.msra.mxu3 %v3795_v7  ;;  %v3191_v6 = vor.u32 %v4084_v1, %v3188_v2  ;;  %v4243_v7 = vld [vmem:[%s6546_s3 + $0x59c] sm:$0xf]  ;;  %v3516_v1 = vld [vmem:[%s6546_s3 + $0x468] sm:$0xf0] }
 0x204   :  { %2002 = vmatpush.bf16.msrb.mxu1 %v3803_v10  ;;  %2041 = vmatpush.bf16.msrb.mxu0 %v3815_v11  ;;  %v4284_v10 = vld [vmem:[%s6546_s3 + $0x6dc] sm:$0xf0]  ;;  %v3834_v11 = vld [vmem:[%s6546_s3 + $0x5a8] sm:$0xf]  ;;  %v3823_v17 = vor.u32 %v4243_v7, %v3820_v8  ;;  %v4207_v7 = vld [vmem:[%s6546_s3 + $0x474] sm:$0xf0] }
 0x205   :  { %v3835_v21 = vor.u32 %v4285_v12, %v3834_v11  ;;  %v4168_v8 = vld [vmem:[%s6546_s3 + $0x344] sm:$0xf]  ;;  %v4085_v12 = vld [vmem:[%s6546_s3 + $0xac] sm:$0xf] }
 0x207   :  { %1964 = vmatpush.bf16.msra.mxu2 %v3471_v18  ;;  %1977 = vmatpush.bf16.msra.mxu3 %v3475_v19  ;;  %v3827_v18 = vor.u32 %v4284_v10, %v3826_v9  ;;  %v4163_v19 = vld [vmem:[%s6546_s3 + $0x31c] sm:$0xf]  ;;  %v3540_v9 = vld [vmem:[%s6546_s3 + $0x480] sm:$0xf0]  ;;  %v3519_v10 = vor.u32 %v4165_v0, %v3516_v1 }
 0x208   :  { %2003 = vmatpush.bf16.msrb.mxu1 %v3483_v22  ;;  %2042 = vmatpush.bf16.msrb.mxu0 %v3495_v23  ;;  %v3847_v22 = vor.u32 %v4246_v13, %v3844_v14  ;;  %v3506_v23 = vld [vmem:[%s6546_s3 + $0x320] sm:$0xf]  ;;  %v3503_v29 = vor.u32 %v4163_v19, %v3500_v20  ;;  %v3196_v13 = vld [vmem:[%s6546_s3 + $0x1e8] sm:$0xf0]  ;;  %v3543_v19 = vor.u32 %v4168_v8, %v3540_v9  ;;  %v3202_v20 = vld [vmem:[%s6546_s3 + $0xb0] sm:$0xf] }
 0x209   :  { %v3199_v28 = vor.u32 %v4085_v12, %v3196_v13  ;;  %v3212_v0 = vld [vmem:[%s6546_s3 + $0x1f8] sm:$0xf0]  ;;  %v4129_v8 = vld [vmem:[%s6546_s3 + $0x204] sm:$0xf0]  ;;  %v4090_v9 = vld [vmem:[%s6546_s3 + $0xd4] sm:$0xf] }
 0x20b   :  { %1965 = vmatpush.bf16.msra.mxu2 %v3151_v30  ;;  %1978 = vmatpush.bf16.msra.mxu3 %v3155_v31  ;;  %v3507_v30 = vor.u32 %v4204_v24, %v3506_v23  ;;  %v4083_v31 = vld [vmem:[%s6546_s3 + $0x9c] sm:$0xf]  ;;  %v4127_v23 = vld [vmem:[%s6546_s3 + $0x1f4] sm:$0xf0]  ;;  %v4088_v24 = vld [vmem:[%s6546_s3 + $0xc4] sm:$0xf] }
 0x20c   :  { %2004 = vmatpush.bf16.msrb.mxu1 %v3163_v32  ;;  %2043 = vmatpush.bf16.msrb.mxu0 %v3175_v33  ;;  %v3180_v32 = vld [vmem:[%s6546_s3 + $0x1d8] sm:$0xf0] }
 0x20d   :  { %v3183_v46 = vor.u32 %v4083_v31, %v3180_v32  ;;  %v3223_v31 = vor.u32 %v4088_v24, %v3220_v25  ;;  %v4247_v32 = vld [vmem:[%s6546_s3 + $0x5bc] sm:$0xf]  ;;  %v3874_v25 = vld [vmem:[%s6546_s3 + $0x5d0] sm:$0xf] }
 0x211   :  { %4011 = vmatmul.msk.bf16.vlgmr.msrb.gmra.mxu2 %vm28_vm0, %v4702_v38  ;;  %4012 = vmatmul.msk.bf16.vlgmr.msrb.gmra.mxu3 %vm28_vm0, %v4702_v38 }
 0x212   :  { %4014 = vmatmul.msk.bf16.vlgmr.msra.gmra.mxu1 %vm28_vm0, %v4702_v38  ;;  %4017 = vmatmul.msk.bf16.vlgmr.msra.gmra.mxu0 %vm28_vm0, %v4702_v38 }
 0x213   :  { %2015 = vmatpush.bf16.msrb.mxu2 %v3807_v43  ;;  %2028 = vmatpush.bf16.msrb.mxu3 %v3811_v44  ;;  %v3204_v43 = vld [vmem:[%s6546_s3 + $0x1f0] sm:$0xf0] }
 0x214   :  { %2054 = vmatpush.bf16.msra.mxu1 %v3819_v47  ;;  %2093 = vmatpush.bf16.msra.mxu0 %v3831_v48  ;;  %v3187_v47 = vor.u32 %v4124_v39, %v3186_v37  ;;  %v3195_v48 = vor.u32 %v4125_v41, %v3194_v40  ;;  %v3207_v49 = vor.u32 %v4086_v42, %v3204_v43  ;;  %v3858_v39 = vld [vmem:[%s6546_s3 + $0x5c0] sm:$0xf]  ;;  %v3866_v41 = vld [vmem:[%s6546_s3 + $0x5c8] sm:$0xf]  ;;  %v4250_v43 = vld [vmem:[%s6546_s3 + $0x5d4] sm:$0xf] }
 0x215   :  { %v4288_v40 = vld [vmem:[%s6546_s3 + $0x6fc] sm:$0xf0]  ;;  %v4289_v42 = vld [vmem:[%s6546_s3 + $0x704] sm:$0xf0] }
 0x216   :  { %v3867_v51 = vor.u32 %v4289_v42, %v3866_v41  ;;  %v3554_v42 = vld [vmem:[%s6546_s3 + $0x350] sm:$0xf] }
 0x217   :  { %2016 = vmatpush.bf16.msrb.mxu2 %v3487_v55  ;;  %2029 = vmatpush.bf16.msrb.mxu3 %v3491_v56  ;;  %v4286_v55 = vld [vmem:[%s6546_s3 + $0x6ec] sm:$0xf0]  ;;  %v3850_v56 = vld [vmem:[%s6546_s3 + $0x5b8] sm:$0xf] }
 0x218   :  { %2055 = vmatpush.bf16.msra.mxu1 %v3499_v59  ;;  %2094 = vmatpush.bf16.msra.mxu0 %v3511_v60  ;;  %v3860_v59 = vld [vmem:[%s6546_s3 + $0x700] sm:$0xf0]  ;;  %v3843_v63 = vor.u32 %v4286_v55, %v3842_v54  ;;  %v3851_v2 = vor.u32 %v4287_v57, %v3850_v56  ;;  %v4208_v54 = vld [vmem:[%s6546_s3 + $0x47c] sm:$0xf0]  ;;  %v3546_v55 = vld [vmem:[%s6546_s3 + $0x348] sm:$0xf] }
 0x219   :  { %v4209_v56 = vld [vmem:[%s6546_s3 + $0x484] sm:$0xf0]  ;;  %v4170_v57 = vld [vmem:[%s6546_s3 + $0x354] sm:$0xf] }
 0x21b   :  { %2017 = vmatpush.bf16.msrb.mxu2 %v3167_v3  ;;  %2030 = vmatpush.bf16.msrb.mxu3 %v3171_v4  ;;  %v3863_v3 = vor.u32 %v4248_v58, %v3860_v59  ;;  %v3522_v4 = vld [vmem:[%s6546_s3 + $0x330] sm:$0xf]  ;;  %v3556_v58 = vld [vmem:[%s6546_s3 + $0x490] sm:$0xf0] }
 0x21c   :  { %2056 = vmatpush.bf16.msra.mxu1 %v3179_v5  ;;  %2095 = vmatpush.bf16.msra.mxu0 %v3191_v6  ;;  %v4206_v5 = vld [vmem:[%s6546_s3 + $0x46c] sm:$0xf0]  ;;  %v3530_v6 = vld [vmem:[%s6546_s3 + $0x338] sm:$0xf] }
 0x21d   :  { %v3523_v11 = vor.u32 %v4206_v5, %v3522_v4  ;;  %v3559_v4 = vor.u32 %v4170_v57, %v3556_v58  ;;  %v3218_v5 = vld [vmem:[%s6546_s3 + $0xc0] sm:$0xf]  ;;  %v3234_v58 = vld [vmem:[%s6546_s3 + $0xd0] sm:$0xf] }
 0x21f   :  { %v5346_v15 = vpop.f32.mrf.mxu1  ;;  %v5348_v16 = vpop.f32.mrf.mxu0 }
 0x220   :  { %6593 = vst [vmem:[#allocation2_spill] sm:$0xff] %v5348_v16 }
 0x221   :  { %4015 = vmatmul.msk.bf16.vlgmr.msra.gmra.mxu2 %vm28_vm0, %v4702_v38  ;;  %4016 = vmatmul.msk.bf16.vlgmr.msra.gmra.mxu3 %vm28_vm0, %v4702_v38 }
 0x222   :  { %4018 = vmatmul.msk.bf16.vlgmr.msrb.gmra.mxu1 %vm28_vm0, %v4702_v38  ;;  %4021 = vmatmul.msk.bf16.vlgmr.msrb.gmra.mxu0 %vm28_vm0, %v4702_v38 }
 0x223   :  { %2067 = vmatpush.bf16.msra.mxu2 %v3823_v17  ;;  %2080 = vmatpush.bf16.msra.mxu3 %v3827_v18  ;;  %v3531_v18 = vor.u32 %v4207_v7, %v3530_v6  ;;  %v4128_v6 = vld [vmem:[%s6546_s3 + $0x1fc] sm:$0xf0]  ;;  %v3226_v7 = vld [vmem:[%s6546_s3 + $0xc8] sm:$0xf] }
 0x224   :  { %v5388_v33 = vpop.f32.mrf.mxu2  ;;  %v5390_v34 = vpop.f32.mrf.mxu3  ;;  %2106 = vmatpush.bf16.msrb.mxu1 %v3835_v21  ;;  %2145 = vmatpush.bf16.msrb.mxu0 %v3847_v22  ;;  %v4126_v21 = vld [vmem:[%s6546_s3 + $0x1ec] sm:$0xf0]  ;;  %v3210_v22 = vld [vmem:[%s6546_s3 + $0xb8] sm:$0xf] }
 0x225   :  { %6594 = vst [vmem:[#allocation3_spill] sm:$0xff] %v5388_v33 }
 0x227   :  { %v1592_v44 = vpop.f32.mrf.mxu1  ;;  %v1631_v45 = vpop.f32.mrf.mxu0  ;;  %2068 = vmatpush.bf16.msra.mxu2 %v3503_v29  ;;  %2081 = vmatpush.bf16.msra.mxu3 %v3507_v30  ;;  %v3203_v29 = vor.u32 %v4126_v21, %v3202_v20  ;;  %v3211_v30 = vor.u32 %v4127_v23, %v3210_v22  ;;  %v4249_v21 = vld [vmem:[%s6546_s3 + $0x5cc] sm:$0xf] }
 0x228   :  { %2107 = vmatpush.bf16.msrb.mxu1 %v3515_v35  ;;  %2146 = vmatpush.bf16.msrb.mxu0 %v3527_v36  ;;  %v3852_v35 = vld [vmem:[%s6546_s3 + $0x6f8] sm:$0xf0]  ;;  %v3876_v44 = vld [vmem:[%s6546_s3 + $0x710] sm:$0xf0]  ;;  %v3868_v22 = vld [vmem:[%s6546_s3 + $0x708] sm:$0xf0] }
 0x22b   :  { %2069 = vmatpush.bf16.msra.mxu2 %v3183_v46  ;;  %2082 = vmatpush.bf16.msra.mxu3 %v3187_v47  ;;  %v3855_v47 = vor.u32 %v4247_v32, %v3852_v35  ;;  %v3871_v35 = vor.u32 %v4249_v21, %v3868_v22  ;;  %v4293_v21 = vld [vmem:[%s6546_s3 + $0x724] sm:$0xf0]  ;;  %v4254_v22 = vld [vmem:[%s6546_s3 + $0x5f4] sm:$0xf] }
 0x22c   :  { %v1566_v52 = vpop.f32.mrf.mxu2  ;;  %v1579_v53 = vpop.f32.mrf.mxu3  ;;  %2108 = vmatpush.bf16.msrb.mxu1 %v3195_v48  ;;  %2147 = vmatpush.bf16.msrb.mxu0 %v3207_v49  ;;  %v3859_v48 = vor.u32 %v4288_v40, %v3858_v39  ;;  %v4167_v49 = vld [vmem:[%s6546_s3 + $0x33c] sm:$0xf]  ;;  %v3548_v39 = vld [vmem:[%s6546_s3 + $0x488] sm:$0xf0] }
 0x22d   :  { %v3879_v52 = vor.u32 %v4250_v43, %v3876_v44  ;;  %v3538_v53 = vld [vmem:[%s6546_s3 + $0x340] sm:$0xf]  ;;  %v3535_v59 = vor.u32 %v4167_v49, %v3532_v50  ;;  %v4210_v43 = vld [vmem:[%s6546_s3 + $0x48c] sm:$0xf0]  ;;  %v3562_v44 = vld [vmem:[%s6546_s3 + $0x358] sm:$0xf] }
 0x22e   :  { %v3572_v49 = vld [vmem:[%s6546_s3 + $0x4a0] sm:$0xf0] }
 0x22f   :  { %v5434_v60 = vpop.f32.mrf.mxu1  ;;  %v5436_v61 = vpop.f32.mrf.mxu0 }
 0x230   :  { %6595 = vst [vmem:[#allocation4_spill] sm:$0xff] %v5434_v60 }
 0x231   :  { %4019 = vmatmul.msk.bf16.vlgmr.msrb.gmra.mxu2 %vm28_vm0, %v4702_v38  ;;  %4020 = vmatmul.msk.bf16.vlgmr.msrb.gmra.mxu3 %vm28_vm0, %v4702_v38 }
 0x232   :  { %4022 = vmatmul.msk.bf16.vlgmr.msra.gmra.mxu1 %vm28_vm0, %v4702_v38  ;;  %4025 = vmatmul.msk.bf16.vlgmr.msra.gmra.mxu0 %vm28_vm0, %v4702_v38 }
 0x233   :  { %2119 = vmatpush.bf16.msrb.mxu2 %v3839_v62  ;;  %2132 = vmatpush.bf16.msrb.mxu3 %v3843_v63  ;;  %v3539_v62 = vor.u32 %v4208_v54, %v3538_v53  ;;  %v4087_v63 = vld [vmem:[%s6546_s3 + $0xbc] sm:$0xf]  ;;  %v3228_v53 = vld [vmem:[%s6546_s3 + $0x208] sm:$0xf0] }
 0x234   :  { %v5476_v14 = vpop.f32.mrf.mxu2  ;;  %v5478_v17 = vpop.f32.mrf.mxu3  ;;  %2158 = vmatpush.bf16.msra.mxu1 %v3851_v2  ;;  %2197 = vmatpush.bf16.msra.mxu0 %v3863_v3  ;;  %v3547_v3 = vor.u32 %v4209_v56, %v3546_v55  ;;  %v3215_v13 = vor.u32 %v4087_v63, %v3212_v0  ;;  %v4131_v63 = vld [vmem:[%s6546_s3 + $0x214] sm:$0xf0]  ;;  %v4092_v0 = vld [vmem:[%s6546_s3 + $0xe4] sm:$0xf] }
 0x235   :  { %6596 = vst [vmem:[#allocation5_spill] sm:$0xff] %v5478_v17 }
 0x237   :  { %v1644_v26 = vpop.f32.mrf.mxu1  ;;  %v1683_v27 = vpop.f32.mrf.mxu0  ;;  %2120 = vmatpush.bf16.msrb.mxu2 %v3519_v10  ;;  %2133 = vmatpush.bf16.msrb.mxu3 %v3523_v11  ;;  %v3236_v10 = vld [vmem:[%s6546_s3 + $0x210] sm:$0xf0] }
 0x238   :  { %2159 = vmatpush.bf16.msra.mxu1 %v3531_v18  ;;  %2198 = vmatpush.bf16.msra.mxu0 %v3543_v19  ;;  %v3219_v18 = vor.u32 %v4128_v6, %v3218_v5  ;;  %v3227_v19 = vor.u32 %v4129_v8, %v3226_v7  ;;  %v3239_v20 = vor.u32 %v4090_v9, %v3236_v10  ;;  %v4290_v26 = vld [vmem:[%s6546_s3 + $0x70c] sm:$0xf0]  ;;  %v3882_v27 = vld [vmem:[%s6546_s3 + $0x5d8] sm:$0xf]  ;;  %v4251_v10 = vld [vmem:[%s6546_s3 + $0x5dc] sm:$0xf] }
 0x23b   :  { %2121 = vmatpush.bf16.msrb.mxu2 %v3199_v28  ;;  %2134 = vmatpush.bf16.msrb.mxu3 %v3203_v29  ;;  %v4291_v28 = vld [vmem:[%s6546_s3 + $0x714] sm:$0xf0]  ;;  %v4252_v29 = vld [vmem:[%s6546_s3 + $0x5e4] sm:$0xf] }
 0x23c   :  { %v1605_v36 = vpop.f32.mrf.mxu2  ;;  %v1618_v37 = vpop.f32.mrf.mxu3  ;;  %2160 = vmatpush.bf16.msra.mxu1 %v3211_v30  ;;  %2199 = vmatpush.bf16.msra.mxu0 %v3223_v31  ;;  %v3892_v30 = vld [vmem:[%s6546_s3 + $0x720] sm:$0xf0]  ;;  %v3883_v40 = vor.u32 %v4291_v28, %v3882_v27  ;;  %v4171_v28 = vld [vmem:[%s6546_s3 + $0x35c] sm:$0xf] }
 0x23d   :  { %v3875_v36 = vor.u32 %v4290_v26, %v3874_v25  ;;  %v4169_v37 = vld [vmem:[%s6546_s3 + $0x34c] sm:$0xf]  ;;  %v3895_v41 = vor.u32 %v4252_v29, %v3892_v30  ;;  %v3564_v29 = vld [vmem:[%s6546_s3 + $0x498] sm:$0xf0] }
 0x23e   :  { %v3551_v50 = vor.u32 %v4169_v37, %v3548_v39  ;;  %v4212_v37 = vld [vmem:[%s6546_s3 + $0x49c] sm:$0xf0]  ;;  %v3578_v39 = vld [vmem:[%s6546_s3 + $0x368] sm:$0xf] }
 0x23f   :  { %v5522_v45 = vpop.f32.mrf.mxu1  ;;  %v5524_v46 = vpop.f32.mrf.mxu0 }
 0x240   :  { %6597 = vst [vmem:[#allocation6_spill] sm:$0xff] %v5522_v45 }
 0x241   :  { %4023 = vmatmul.msk.bf16.vlgmr.msra.gmra.mxu2 %vm28_vm0, %v4702_v38  ;;  %4024 = vmatmul.msk.bf16.vlgmr.msra.gmra.mxu3 %vm28_vm0, %v4702_v38 }
 0x242   :  { %4026 = vmatmul.msk.bf16.vlgmr.msrb.gmra.mxu1 %vm28_vm0, %v4702_v38  ;;  %4029 = vmatmul.msk.bf16.vlgmr.msrb.gmra.mxu0 %vm28_vm0, %v4702_v38 }
 0x243   :  { %2171 = vmatpush.bf16.msra.mxu2 %v3855_v47  ;;  %2184 = vmatpush.bf16.msra.mxu3 %v3859_v48  ;;  %v4211_v47 = vld [vmem:[%s6546_s3 + $0x494] sm:$0xf0]  ;;  %v4172_v48 = vld [vmem:[%s6546_s3 + $0x364] sm:$0xf] }
 0x244   :  { %v5564_v1 = vpop.f32.mrf.mxu2  ;;  %v5566_v2 = vpop.f32.mrf.mxu3  ;;  %2210 = vmatpush.bf16.msrb.mxu1 %v3867_v51  ;;  %2249 = vmatpush.bf16.msrb.mxu0 %v3879_v52  ;;  %v3555_v51 = vor.u32 %v4210_v43, %v3554_v42  ;;  %v4089_v52 = vld [vmem:[%s6546_s3 + $0xcc] sm:$0xf]  ;;  %v3563_v56 = vor.u32 %v4211_v47, %v3562_v44  ;;  %v3575_v57 = vor.u32 %v4172_v48, %v3572_v49  ;;  %v3588_v42 = vld [vmem:[%s6546_s3 + $0x4b0] sm:$0xf0]  ;;  %v4091_v47 = vld [vmem:[%s6546_s3 + $0xdc] sm:$0xf] }
 0x245   :  { %6598 = vst [vmem:[#allocation7_spill] sm:$0xff] %v5564_v1  ;;  %v3231_v6 = vor.u32 %v4089_v52, %v3228_v53  ;;  %v3567_v43 = vor.u32 %v4171_v28, %v3564_v29  ;;  %v3244_v48 = vld [vmem:[%s6546_s3 + $0x218] sm:$0xf0]  ;;  %v3250_v53 = vld [vmem:[%s6546_s3 + $0xe0] sm:$0xf] }
 0x246   :  { %v3580_v28 = vld [vmem:[%s6546_s3 + $0x4a8] sm:$0xf0] }
 0x247   :  { %v1696_v11 = vpop.f32.mrf.mxu1  ;;  %v1735_v12 = vpop.f32.mrf.mxu0  ;;  %2172 = vmatpush.bf16.msra.mxu2 %v3535_v59  ;;  %2185 = vmatpush.bf16.msra.mxu3 %v3539_v62  ;;  %v4130_v59 = vld [vmem:[%s6546_s3 + $0x20c] sm:$0xf0]  ;;  %v3242_v62 = vld [vmem:[%s6546_s3 + $0xd8] sm:$0xf] }
 0x248   :  { %2211 = vmatpush.bf16.msrb.mxu1 %v3547_v3  ;;  %2250 = vmatpush.bf16.msrb.mxu0 %v3559_v4  ;;  %v3252_v3 = vld [vmem:[%s6546_s3 + $0x220] sm:$0xf0]  ;;  %v3235_v7 = vor.u32 %v4130_v59, %v3234_v58  ;;  %v3243_v8 = vor.u32 %v4131_v63, %v3242_v62  ;;  %v3884_v11 = vld [vmem:[%s6546_s3 + $0x718] sm:$0xf0]  ;;  %v4133_v58 = vld [vmem:[%s6546_s3 + $0x224] sm:$0xf0] }
 0x249   :  { %v3255_v9 = vor.u32 %v4092_v0, %v3252_v3  ;;  %v3887_v26 = vor.u32 %v4251_v10, %v3884_v11  ;;  %v4094_v59 = vld [vmem:[%s6546_s3 + $0xf4] sm:$0xf]  ;;  %v3247_v3 = vor.u32 %v4091_v47, %v3244_v48  ;;  %v3906_v11 = vld [vmem:[%s6546_s3 + $0x5f0] sm:$0xf]  ;;  %v3260_v47 = vld [vmem:[%s6546_s3 + $0x228] sm:$0xf0] }
 0x24a   :  { %v3268_v62 = vld [vmem:[%s6546_s3 + $0x230] sm:$0xf0] }
 0x24b   :  { %2173 = vmatpush.bf16.msra.mxu2 %v3215_v13  ;;  %2186 = vmatpush.bf16.msra.mxu3 %v3219_v18  ;;  %v3890_v18 = vld [vmem:[%s6546_s3 + $0x5e0] sm:$0xf] }
 0x24c   :  { %v1657_v23 = vpop.f32.mrf.mxu2  ;;  %v1670_v24 = vpop.f32.mrf.mxu3  ;;  %2212 = vmatpush.bf16.msrb.mxu1 %v3227_v19  ;;  %2251 = vmatpush.bf16.msrb.mxu0 %v3239_v20  ;;  %v4292_v19 = vld [vmem:[%s6546_s3 + $0x71c] sm:$0xf0]  ;;  %v3898_v20 = vld [vmem:[%s6546_s3 + $0x5e8] sm:$0xf] }
 0x24d   :  { %v3908_v23 = vld [vmem:[%s6546_s3 + $0x730] sm:$0xf0]  ;;  %v3891_v27 = vor.u32 %v4292_v19, %v3890_v18  ;;  %v3899_v30 = vor.u32 %v4293_v21, %v3898_v20  ;;  %v4295_v18 = vld [vmem:[%s6546_s3 + $0x734] sm:$0xf0]  ;;  %v4256_v19 = vld [vmem:[%s6546_s3 + $0x604] sm:$0xf] }
 0x24e   :  { %v3924_v20 = vld [vmem:[%s6546_s3 + $0x740] sm:$0xf0] }
 0x24f   :  { %v5610_v31 = vpop.f32.mrf.mxu1  ;;  %v5612_v32 = vpop.f32.mrf.mxu0 }
 0x251   :  { %4027 = vmatmul.msk.bf16.vlgmr.msrb.gmra.mxu2 %vm28_vm0, %v4702_v38  ;;  %4028 = vmatmul.msk.bf16.vlgmr.msrb.gmra.mxu3 %vm28_vm0, %v4702_v38 }
 0x252   :  { %4030 = vmatmul.msk.bf16.vlgmr.msra.gmra.mxu1 %vm28_vm0, %v4702_v38  ;;  %4033 = vmatmul.msk.bf16.vlgmr.msra.gmra.mxu0 %vm28_vm0, %v4702_v38 }
 0x253   :  { %2223 = vmatpush.bf16.msrb.mxu2 %v3871_v35  ;;  %2236 = vmatpush.bf16.msrb.mxu3 %v3875_v36  ;;  %v3911_v35 = vor.u32 %v4254_v22, %v3908_v23  ;;  %v3570_v36 = vld [vmem:[%s6546_s3 + $0x360] sm:$0xf] }
 0x254   :  { %v5652_v54 = vpop.f32.mrf.mxu2  ;;  %v5654_v55 = vpop.f32.mrf.mxu3  ;;  %2262 = vmatpush.bf16.msra.mxu1 %v3883_v40  ;;  %2301 = vmatpush.bf16.msra.mxu0 %v3895_v41  ;;  %v4213_v40 = vld [vmem:[%s6546_s3 + $0x4a4] sm:$0xf0]  ;;  %v4174_v41 = vld [vmem:[%s6546_s3 + $0x374] sm:$0xf]  ;;  %v3571_v44 = vor.u32 %v4212_v37, %v3570_v36  ;;  %v4214_v36 = vld [vmem:[%s6546_s3 + $0x4ac] sm:$0xf0] }
 0x255   :  { %6599 = vst [vmem:[#allocation8_spill] sm:$0xff] %v5652_v54  ;;  %v3591_v52 = vor.u32 %v4174_v41, %v3588_v42  ;;  %v3594_v37 = vld [vmem:[%s6546_s3 + $0x378] sm:$0xf]  ;;  %v3604_v41 = vld [vmem:[%s6546_s3 + $0x4c0] sm:$0xf0] }
 0x256   :  { %6600 = vst [vmem:[#allocation9_spill] sm:$0xff] %v5654_v55 }
 0x257   :  { %v1748_v4 = vpop.f32.mrf.mxu1  ;;  %v1787_v5 = vpop.f32.mrf.mxu0  ;;  %2224 = vmatpush.bf16.msrb.mxu2 %v3551_v50  ;;  %2237 = vmatpush.bf16.msrb.mxu3 %v3555_v51  ;;  %v3579_v51 = vor.u32 %v4213_v40, %v3578_v39  ;;  %v4215_v39 = vld [vmem:[%s6546_s3 + $0x4b4] sm:$0xf0]  ;;  %v4176_v40 = vld [vmem:[%s6546_s3 + $0x384] sm:$0xf] }
 0x258   :  { %2263 = vmatpush.bf16.msra.mxu1 %v3563_v56  ;;  %2302 = vmatpush.bf16.msra.mxu0 %v3575_v57  ;;  %v4132_v56 = vld [vmem:[%s6546_s3 + $0x21c] sm:$0xf0]  ;;  %v3258_v57 = vld [vmem:[%s6546_s3 + $0xe8] sm:$0xf] }
 0x259   :  { %v3251_v4 = vor.u32 %v4132_v56, %v3250_v53  ;;  %v3259_v5 = vor.u32 %v4133_v58, %v3258_v57  ;;  %v3607_v53 = vor.u32 %v4176_v40, %v3604_v41  ;;  %v3266_v56 = vld [vmem:[%s6546_s3 + $0xf0] sm:$0xf]  ;;  %v3274_v58 = vld [vmem:[%s6546_s3 + $0xf8] sm:$0xf]  ;;  %v4216_v40 = vld [vmem:[%s6546_s3 + $0x4bc] sm:$0xf0] }
 0x25a   :  { %v4134_v57 = vld [vmem:[%s6546_s3 + $0x22c] sm:$0xf0]  ;;  %v3610_v41 = vld [vmem:[%s6546_s3 + $0x388] sm:$0xf] }
 0x25b   :  { %2225 = vmatpush.bf16.msrb.mxu2 %v3231_v6  ;;  %2238 = vmatpush.bf16.msrb.mxu3 %v3235_v7  ;;  %v3271_v6 = vor.u32 %v4094_v59, %v3268_v62  ;;  %v4253_v7 = vld [vmem:[%s6546_s3 + $0x5ec] sm:$0xf]  ;;  %v4135_v59 = vld [vmem:[%s6546_s3 + $0x234] sm:$0xf0]  ;;  %v4096_v62 = vld [vmem:[%s6546_s3 + $0x104] sm:$0xf] }
 0x25c   :  { %v1709_v12 = vpop.f32.mrf.mxu2  ;;  %v1722_v13 = vpop.f32.mrf.mxu3  ;;  %2264 = vmatpush.bf16.msra.mxu1 %v3243_v8  ;;  %2303 = vmatpush.bf16.msra.mxu0 %v3255_v9  ;;  %v3900_v8 = vld [vmem:[%s6546_s3 + $0x728] sm:$0xf0] }
 0x25d   :  { %v4294_v12 = vld [vmem:[%s6546_s3 + $0x72c] sm:$0xf0]  ;;  %v3914_v13 = vld [vmem:[%s6546_s3 + $0x5f8] sm:$0xf]  ;;  %v3903_v23 = vor.u32 %v4253_v7, %v3900_v8  ;;  %v4255_v8 = vld [vmem:[%s6546_s3 + $0x5fc] sm:$0xf] }
 0x25e   :  { %v3915_v29 = vor.u32 %v4295_v18, %v3914_v13  ;;  %v4296_v13 = vld [vmem:[%s6546_s3 + $0x73c] sm:$0xf0]  ;;  %v3930_v18 = vld [vmem:[%s6546_s3 + $0x608] sm:$0xf] }
 0x25f   :  { %v5698_v24 = vpop.f32.mrf.mxu1  ;;  %v5700_v25 = vpop.f32.mrf.mxu0 }
 0x261   :  { %4031 = vmatmul.msk.bf16.vlgmr.msra.gmra.mxu2 %vm28_vm0, %v4702_v38  ;;  %4032 = vmatmul.msk.bf16.vlgmr.msra.gmra.mxu3 %vm28_vm0, %v4702_v38 }
 0x262   :  { %4034 = vmatmul.msk.bf16.vlgmr.msrb.gmra.mxu1 %vm28_vm0, %v4702_v38  ;;  %4037 = vmatmul.msk.bf16.vlgmr.msrb.gmra.mxu0 %vm28_vm0, %v4702_v38 }
 0x263   :  { %2275 = vmatpush.bf16.msra.mxu2 %v3887_v26  ;;  %2288 = vmatpush.bf16.msra.mxu3 %v3891_v27  ;;  %v3907_v26 = vor.u32 %v4294_v12, %v3906_v11  ;;  %v4173_v27 = vld [vmem:[%s6546_s3 + $0x36c] sm:$0xf]  ;;  %v3922_v12 = vld [vmem:[%s6546_s3 + $0x600] sm:$0xf] }
 0x264   :  { %v5740_v49 = vpop.f32.mrf.mxu2  ;;  %v5742_v50 = vpop.f32.mrf.mxu3  ;;  %2314 = vmatpush.bf16.msrb.mxu1 %v3899_v30  ;;  %2353 = vmatpush.bf16.msrb.mxu0 %v3911_v35  ;;  %v3927_v30 = vor.u32 %v4256_v19, %v3924_v20  ;;  %v3586_v35 = vld [vmem:[%s6546_s3 + $0x370] sm:$0xf]  ;;  %v3583_v42 = vor.u32 %v4173_v27, %v3580_v28  ;;  %v4297_v19 = vld [vmem:[%s6546_s3 + $0x744] sm:$0xf0]  ;;  %v4258_v20 = vld [vmem:[%s6546_s3 + $0x614] sm:$0xf] }
 0x267   :  { %v1800_v63 = vpop.f32.mrf.mxu1  ;;  %v1839_v0 = vpop.f32.mrf.mxu0  ;;  %2276 = vmatpush.bf16.msra.mxu2 %v3567_v43  ;;  %2289 = vmatpush.bf16.msra.mxu3 %v3571_v44  ;;  %v3587_v43 = vor.u32 %v4214_v36, %v3586_v35  ;;  %v4093_v44 = vld [vmem:[%s6546_s3 + $0xec] sm:$0xf]  ;;  %v3596_v35 = vld [vmem:[%s6546_s3 + $0x4b8] sm:$0xf0]  ;;  %v3931_v36 = vor.u32 %v4297_v19, %v3930_v18 }
 0x268   :  { %2315 = vmatpush.bf16.msrb.mxu1 %v3579_v51  ;;  %2354 = vmatpush.bf16.msrb.mxu0 %v3591_v52  ;;  %v3595_v52 = vor.u32 %v4215_v39, %v3594_v37  ;;  %v3284_v63 = vld [vmem:[%s6546_s3 + $0x240] sm:$0xf0]  ;;  %v3602_v39 = vld [vmem:[%s6546_s3 + $0x380] sm:$0xf]  ;;  %v3932_v18 = vld [vmem:[%s6546_s3 + $0x748] sm:$0xf0] }
 0x269   :  { %v3287_v7 = vor.u32 %v4096_v62, %v3284_v63  ;;  %v3282_v63 = vld [vmem:[%s6546_s3 + $0x100] sm:$0xf] }
 0x26b   :  { %2277 = vmatpush.bf16.msra.mxu2 %v3247_v3  ;;  %2290 = vmatpush.bf16.msra.mxu3 %v3251_v4  ;;  %v3263_v4 = vor.u32 %v4093_v44, %v3260_v47  ;;  %v3620_v44 = vld [vmem:[%s6546_s3 + $0x4d0] sm:$0xf0] }
 0x26c   :  { %v1761_v9 = vpop.f32.mrf.mxu2  ;;  %v1774_v10 = vpop.f32.mrf.mxu3  ;;  %2316 = vmatpush.bf16.msrb.mxu1 %v3259_v5  ;;  %2355 = vmatpush.bf16.msrb.mxu0 %v3271_v6  ;;  %v3267_v5 = vor.u32 %v4134_v57, %v3266_v56  ;;  %v3275_v6 = vor.u32 %v4135_v59, %v3274_v58  ;;  %v3276_v56 = vld [vmem:[%s6546_s3 + $0x238] sm:$0xf0] }
 0x26d   :  { %v3916_v9 = vld [vmem:[%s6546_s3 + $0x738] sm:$0xf0] }
 0x26e   :  { %v3919_v28 = vor.u32 %v4255_v8, %v3916_v9 }
 0x26f   :  { %v5786_v21 = vpop.f32.mrf.mxu1  ;;  %v5788_v22 = vpop.f32.mrf.mxu0 }
 0x271   :  { %4035 = vmatmul.msk.bf16.vlgmr.msrb.gmra.mxu2 %vm28_vm0, %v4702_v38  ;;  %4036 = vmatmul.msk.bf16.vlgmr.msrb.gmra.mxu3 %vm28_vm0, %v4702_v38 }
 0x272   :  { %4038 = vmatmul.msk.bf16.vlgmr.msra.gmra.mxu1 %vm28_vm0, %v4702_v38  ;;  %4041 = vmatmul.msk.bf16.vlgmr.msra.gmra.mxu0 %vm28_vm0, %v4702_v38 }
 0x273   :  { %2327 = vmatpush.bf16.msrb.mxu2 %v3903_v23  ;;  %2340 = vmatpush.bf16.msrb.mxu3 %v3907_v26  ;;  %v3940_v23 = vld [vmem:[%s6546_s3 + $0x750] sm:$0xf0] }
 0x274   :  { %v5828_v48 = vpop.f32.mrf.mxu2  ;;  %v5830_v51 = vpop.f32.mrf.mxu3  ;;  %2366 = vmatpush.bf16.msra.mxu1 %v3915_v29  ;;  %2405 = vmatpush.bf16.msra.mxu0 %v3927_v30  ;;  %v3923_v29 = vor.u32 %v4296_v13, %v3922_v12  ;;  %v4175_v30 = vld [vmem:[%s6546_s3 + $0x37c] sm:$0xf]  ;;  %v3943_v37 = vor.u32 %v4258_v20, %v3940_v23  ;;  %v4257_v13 = vld [vmem:[%s6546_s3 + $0x60c] sm:$0xf]  ;;  %v3938_v23 = vld [vmem:[%s6546_s3 + $0x610] sm:$0xf] }
 0x275   :  { %6601 = vst [vmem:[#allocation10_spill] sm:$0xff] %v5828_v48  ;;  %v3599_v47 = vor.u32 %v4175_v30, %v3596_v35  ;;  %v4299_v30 = vld [vmem:[%s6546_s3 + $0x754] sm:$0xf0]  ;;  %v4260_v35 = vld [vmem:[%s6546_s3 + $0x624] sm:$0xf] }
 0x277   :  { %v1852_v0 = vpop.f32.mrf.mxu1  ;;  %v1891_v3 = vpop.f32.mrf.mxu0  ;;  %2328 = vmatpush.bf16.msrb.mxu2 %v3583_v42  ;;  %2341 = vmatpush.bf16.msrb.mxu3 %v3587_v43  ;;  %v4217_v42 = vld [vmem:[%s6546_s3 + $0x4c4] sm:$0xf0]  ;;  %v4178_v43 = vld [vmem:[%s6546_s3 + $0x394] sm:$0xf] }
 0x278   :  { %2367 = vmatpush.bf16.msra.mxu1 %v3595_v52  ;;  %2406 = vmatpush.bf16.msra.mxu0 %v3607_v53  ;;  %v3603_v52 = vor.u32 %v4216_v40, %v3602_v39  ;;  %v4095_v53 = vld [vmem:[%s6546_s3 + $0xfc] sm:$0xf]  ;;  %v3611_v59 = vor.u32 %v4217_v42, %v3610_v41  ;;  %v3623_v62 = vor.u32 %v4178_v43, %v3620_v44  ;;  %v4136_v0 = vld [vmem:[%s6546_s3 + $0x23c] sm:$0xf0]  ;;  %v3290_v3 = vld [vmem:[%s6546_s3 + $0x108] sm:$0xf] }
 0x279   :  { %v3279_v9 = vor.u32 %v4095_v53, %v3276_v56  ;;  %v3935_v40 = vor.u32 %v4257_v13, %v3932_v18  ;;  %v4177_v42 = vld [vmem:[%s6546_s3 + $0x38c] sm:$0xf]  ;;  %v4218_v53 = vld [vmem:[%s6546_s3 + $0x4cc] sm:$0xf0]  ;;  %v3626_v56 = vld [vmem:[%s6546_s3 + $0x398] sm:$0xf] }
 0x27a   :  { %v3612_v43 = vld [vmem:[%s6546_s3 + $0x4c8] sm:$0xf0]  ;;  %v4139_v13 = vld [vmem:[%s6546_s3 + $0x254] sm:$0xf0]  ;;  %v4100_v18 = vld [vmem:[%s6546_s3 + $0x124] sm:$0xf] }
 0x27b   :  { %2329 = vmatpush.bf16.msrb.mxu2 %v3263_v4  ;;  %2342 = vmatpush.bf16.msrb.mxu3 %v3267_v5  ;;  %v4137_v4 = vld [vmem:[%s6546_s3 + $0x244] sm:$0xf0]  ;;  %v4098_v5 = vld [vmem:[%s6546_s3 + $0x114] sm:$0xf] }
 0x27c   :  { %v1813_v10 = vpop.f32.mrf.mxu2  ;;  %v1826_v11 = vpop.f32.mrf.mxu3  ;;  %2368 = vmatpush.bf16.msra.mxu1 %v3275_v6  ;;  %2407 = vmatpush.bf16.msra.mxu0 %v3287_v7  ;;  %v3300_v6 = vld [vmem:[%s6546_s3 + $0x250] sm:$0xf0] }
 0x27d   :  { %v3283_v10 = vor.u32 %v4136_v0, %v3282_v63  ;;  %v3291_v11 = vor.u32 %v4137_v4, %v3290_v3  ;;  %v3303_v12 = vor.u32 %v4098_v5, %v3300_v6  ;;  %v3636_v63 = vld [vmem:[%s6546_s3 + $0x4e0] sm:$0xf0]  ;;  %v3615_v0 = vor.u32 %v4177_v42, %v3612_v43  ;;  %v4097_v4 = vld [vmem:[%s6546_s3 + $0x10c] sm:$0xf]  ;;  %v3954_v43 = vld [vmem:[%s6546_s3 + $0x620] sm:$0xf] }
 0x27e   :  { %v3292_v5 = vld [vmem:[%s6546_s3 + $0x248] sm:$0xf0] }
 0x27f   :  { %v5874_v26 = vpop.f32.mrf.mxu1  ;;  %v5876_v27 = vpop.f32.mrf.mxu0 }
 0x281   :  { %4039 = vmatmul.msk.bf16.vlgmr.msra.gmra.mxu2 %vm28_vm0, %v4702_v38  ;;  %4040 = vmatmul.msk.bf16.vlgmr.msra.gmra.mxu3 %vm28_vm0, %v4702_v38 }
 0x282   :  { %4042 = vmatmul.msk.bf16.vlgmr.msrb.gmra.mxu1 %vm28_vm0, %v4702_v38  ;;  %4045 = vmatmul.msk.bf16.vlgmr.msrb.gmra.mxu0 %vm28_vm0, %v4702_v38 }
 0x283   :  { %2379 = vmatpush.bf16.msra.mxu2 %v3919_v28  ;;  %2392 = vmatpush.bf16.msra.mxu3 %v3923_v29  ;;  %v4298_v28 = vld [vmem:[%s6546_s3 + $0x74c] sm:$0xf0]  ;;  %v3946_v29 = vld [vmem:[%s6546_s3 + $0x618] sm:$0xf] }
 0x284   :  { %v5916_v57 = vpop.f32.mrf.mxu2  ;;  %v5918_v58 = vpop.f32.mrf.mxu3  ;;  %2418 = vmatpush.bf16.msrb.mxu1 %v3931_v36  ;;  %2457 = vmatpush.bf16.msrb.mxu0 %v3943_v37  ;;  %v3956_v36 = vld [vmem:[%s6546_s3 + $0x760] sm:$0xf0]  ;;  %v3939_v41 = vor.u32 %v4298_v28, %v3938_v23  ;;  %v3947_v44 = vor.u32 %v4299_v30, %v3946_v29  ;;  %v3295_v28 = vor.u32 %v4097_v4, %v3292_v5  ;;  %v3628_v4 = vld [vmem:[%s6546_s3 + $0x4d8] sm:$0xf0] }
 0x287   :  { %v1904_v7 = vpop.f32.mrf.mxu1  ;;  %v1943_v8 = vpop.f32.mrf.mxu0  ;;  %2380 = vmatpush.bf16.msra.mxu2 %v3599_v47  ;;  %2393 = vmatpush.bf16.msra.mxu3 %v3603_v52  ;;  %v3959_v47 = vor.u32 %v4260_v35, %v3956_v36  ;;  %v3618_v52 = vld [vmem:[%s6546_s3 + $0x390] sm:$0xf]  ;;  %v4259_v36 = vld [vmem:[%s6546_s3 + $0x61c] sm:$0xf] }
 0x288   :  { %2419 = vmatpush.bf16.msrb.mxu1 %v3611_v59  ;;  %2458 = vmatpush.bf16.msrb.mxu0 %v3623_v62  ;;  %v4219_v59 = vld [vmem:[%s6546_s3 + $0x4d4] sm:$0xf0]  ;;  %v4180_v62 = vld [vmem:[%s6546_s3 + $0x3a4] sm:$0xf]  ;;  %v3619_v3 = vor.u32 %v4218_v53, %v3618_v52  ;;  %v4301_v52 = vld [vmem:[%s6546_s3 + $0x764] sm:$0xf0] }
 0x289   :  { %v3627_v8 = vor.u32 %v4219_v59, %v3626_v56  ;;  %v4262_v53 = vld [vmem:[%s6546_s3 + $0x634] sm:$0xf] }
 0x28a   :  { %v3972_v56 = vld [vmem:[%s6546_s3 + $0x770] sm:$0xf0] }
 0x28b   :  { %2381 = vmatpush.bf16.msra.mxu2 %v3279_v9  ;;  %2394 = vmatpush.bf16.msra.mxu3 %v3283_v10  ;;  %v3639_v9 = vor.u32 %v4180_v62, %v3636_v63  ;;  %v3298_v10 = vld [vmem:[%s6546_s3 + $0x110] sm:$0xf] }
 0x28c   :  { %v1865_v19 = vpop.f32.mrf.mxu2  ;;  %v1878_v20 = vpop.f32.mrf.mxu3  ;;  %2420 = vmatpush.bf16.msrb.mxu1 %v3291_v11  ;;  %2459 = vmatpush.bf16.msrb.mxu0 %v3303_v12  ;;  %v4138_v11 = vld [vmem:[%s6546_s3 + $0x24c] sm:$0xf0]  ;;  %v3306_v12 = vld [vmem:[%s6546_s3 + $0x118] sm:$0xf] }
 0x28d   :  { %v3316_v19 = vld [vmem:[%s6546_s3 + $0x260] sm:$0xf0]  ;;  %v3299_v29 = vor.u32 %v4138_v11, %v3298_v10  ;;  %v3307_v30 = vor.u32 %v4139_v13, %v3306_v12  ;;  %v4220_v10 = vld [vmem:[%s6546_s3 + $0x4dc] sm:$0xf0]  ;;  %v3642_v11 = vld [vmem:[%s6546_s3 + $0x3a8] sm:$0xf] }
 0x28e   :  { %v3319_v35 = vor.u32 %v4100_v18, %v3316_v19  ;;  %v4221_v12 = vld [vmem:[%s6546_s3 + $0x4e4] sm:$0xf0]  ;;  %v4182_v13 = vld [vmem:[%s6546_s3 + $0x3b4] sm:$0xf] }
 0x28f   :  { %v5962_v37 = vpop.f32.mrf.mxu1  ;;  %v5964_v39 = vpop.f32.mrf.mxu0  ;;  %v3652_v18 = vld [vmem:[%s6546_s3 + $0x4f0] sm:$0xf0] }
 0x291   :  { %4043 = vmatmul.msk.bf16.vlgmr.msrb.gmra.mxu2 %vm28_vm0, %v4702_v38  ;;  %4044 = vmatmul.msk.bf16.vlgmr.msrb.gmra.mxu3 %vm28_vm0, %v4702_v38 }
 0x292   :  { %4046 = vmatmul.msk.bf16.vlgmr.msra.gmra.mxu1 %vm28_vm0, %v4702_v38  ;;  %4049 = vmatmul.msk.bf16.vlgmr.msra.gmra.mxu0 %vm28_vm0, %v4702_v38 }
 0x293   :  { %2431 = vmatpush.bf16.msrb.mxu2 %v3935_v40  ;;  %2444 = vmatpush.bf16.msrb.mxu3 %v3939_v41  ;;  %v3948_v40 = vld [vmem:[%s6546_s3 + $0x758] sm:$0xf0] }
 0x294   :  { %v6004_v6 = vpop.f32.mrf.mxu2  ;;  %v6006_v7 = vpop.f32.mrf.mxu3  ;;  %2470 = vmatpush.bf16.msra.mxu1 %v3947_v44  ;;  %2509 = vmatpush.bf16.msra.mxu0 %v3959_v47  ;;  %v4300_v44 = vld [vmem:[%s6546_s3 + $0x75c] sm:$0xf0]  ;;  %v3962_v47 = vld [vmem:[%s6546_s3 + $0x628] sm:$0xf]  ;;  %v3951_v63 = vor.u32 %v4259_v36, %v3948_v40  ;;  %v3655_v36 = vor.u32 %v4182_v13, %v3652_v18  ;;  %v4303_v13 = vld [vmem:[%s6546_s3 + $0x774] sm:$0xf0] }
 0x295   :  { %v3963_v5 = vor.u32 %v4301_v52, %v3962_v47  ;;  %v3314_v40 = vld [vmem:[%s6546_s3 + $0x120] sm:$0xf]  ;;  %v3332_v47 = vld [vmem:[%s6546_s3 + $0x270] sm:$0xf0] }
 0x297   :  { %v1956_v20 = vpop.f32.mrf.mxu1  ;;  %v1995_v23 = vpop.f32.mrf.mxu0  ;;  %2432 = vmatpush.bf16.msrb.mxu2 %v3615_v0  ;;  %2445 = vmatpush.bf16.msrb.mxu3 %v3619_v3  ;;  %v3955_v0 = vor.u32 %v4300_v44, %v3954_v43  ;;  %v4179_v3 = vld [vmem:[%s6546_s3 + $0x39c] sm:$0xf]  ;;  %v4141_v43 = vld [vmem:[%s6546_s3 + $0x264] sm:$0xf0]  ;;  %v4102_v44 = vld [vmem:[%s6546_s3 + $0x134] sm:$0xf] }
 0x298   :  { %2471 = vmatpush.bf16.msra.mxu1 %v3627_v8  ;;  %2510 = vmatpush.bf16.msra.mxu0 %v3639_v9  ;;  %v3975_v8 = vor.u32 %v4262_v53, %v3972_v56  ;;  %v3634_v9 = vld [vmem:[%s6546_s3 + $0x3a0] sm:$0xf]  ;;  %v3631_v19 = vor.u32 %v4179_v3, %v3628_v4  ;;  %v4099_v23 = vld [vmem:[%s6546_s3 + $0x11c] sm:$0xf]  ;;  %v3335_v3 = vor.u32 %v4102_v44, %v3332_v47  ;;  %v4261_v4 = vld [vmem:[%s6546_s3 + $0x62c] sm:$0xf] }
 0x299   :  { %v3635_v20 = vor.u32 %v4220_v10, %v3634_v9  ;;  %v3964_v9 = vld [vmem:[%s6546_s3 + $0x768] sm:$0xf0]  ;;  %v3970_v10 = vld [vmem:[%s6546_s3 + $0x630] sm:$0xf] }
 0x29b   :  { %2433 = vmatpush.bf16.msrb.mxu2 %v3295_v28  ;;  %2446 = vmatpush.bf16.msrb.mxu3 %v3299_v29  ;;  %v3308_v28 = vld [vmem:[%s6546_s3 + $0x258] sm:$0xf0] }
 0x29c   :  { %v1917_v41 = vpop.f32.mrf.mxu2  ;;  %v1930_v42 = vpop.f32.mrf.mxu3  ;;  %2472 = vmatpush.bf16.msra.mxu1 %v3307_v30  ;;  %2511 = vmatpush.bf16.msra.mxu0 %v3319_v35  ;;  %v3643_v35 = vor.u32 %v4221_v12, %v3642_v11  ;;  %v3311_v56 = vor.u32 %v4099_v23, %v3308_v28  ;;  %v4302_v11 = vld [vmem:[%s6546_s3 + $0x76c] sm:$0xf0]  ;;  %v3978_v12 = vld [vmem:[%s6546_s3 + $0x638] sm:$0xf]  ;;  %v4181_v28 = vld [vmem:[%s6546_s3 + $0x3ac] sm:$0xf] }
 0x29d   :  { %v4140_v41 = vld [vmem:[%s6546_s3 + $0x25c] sm:$0xf0]  ;;  %v3322_v42 = vld [vmem:[%s6546_s3 + $0x128] sm:$0xf]  ;;  %v3971_v23 = vor.u32 %v4302_v11, %v3970_v10 }
 0x29f   :  { %v6050_v59 = vpop.f32.mrf.mxu1  ;;  %v6052_v62 = vpop.f32.mrf.mxu0 }
 0x2a0   :  { %6602 = vst [vmem:[#allocation11_spill] sm:$0xff] %v6052_v62 }
 0x2a1   :  { %4047 = vmatmul.msk.bf16.vlgmr.msra.gmra.mxu2 %vm28_vm0, %v4702_v38  ;;  %4048 = vmatmul.msk.bf16.vlgmr.msra.gmra.mxu3 %vm28_vm0, %v4702_v38 }
 0x2a2   :  { %4050 = vmatmul.msk.bf16.vlgmr.msrb.gmra.mxu1 %vm28_vm0, %v4702_v38  ;;  %4053 = vmatmul.msk.bf16.vlgmr.msrb.gmra.mxu0 %vm28_vm0, %v4702_v38 }
 0x2a3   :  { %2483 = vmatpush.bf16.msra.mxu2 %v3951_v63  ;;  %2496 = vmatpush.bf16.msra.mxu3 %v3955_v0  ;;  %v3315_v63 = vor.u32 %v4140_v41, %v3314_v40  ;;  %v3323_v0 = vor.u32 %v4141_v43, %v3322_v42  ;;  %v3650_v40 = vld [vmem:[%s6546_s3 + $0x3b0] sm:$0xf]  ;;  %v3658_v42 = vld [vmem:[%s6546_s3 + $0x3b8] sm:$0xf] }
 0x2a4   :  { %v6092_v29 = vpop.f32.mrf.mxu2  ;;  %v6094_v30 = vpop.f32.mrf.mxu3  ;;  %2522 = vmatpush.bf16.msrb.mxu1 %v3963_v5  ;;  %2561 = vmatpush.bf16.msrb.mxu0 %v3975_v8  ;;  %v4222_v41 = vld [vmem:[%s6546_s3 + $0x4ec] sm:$0xf0]  ;;  %v4223_v43 = vld [vmem:[%s6546_s3 + $0x4f4] sm:$0xf0] }
 0x2a5   :  { %v3651_v47 = vor.u32 %v4222_v41, %v3650_v40 }
 0x2a7   :  { %v2008_v52 = vpop.f32.mrf.mxu1  ;;  %v2047_v53 = vpop.f32.mrf.mxu0  ;;  %2484 = vmatpush.bf16.msra.mxu2 %v3631_v19  ;;  %2497 = vmatpush.bf16.msra.mxu3 %v3635_v20  ;;  %v3967_v20 = vor.u32 %v4261_v4, %v3964_v9  ;;  %v4142_v4 = vld [vmem:[%s6546_s3 + $0x26c] sm:$0xf0] }
 0x2a8   :  { %2523 = vmatpush.bf16.msrb.mxu1 %v3643_v35  ;;  %2562 = vmatpush.bf16.msrb.mxu0 %v3655_v36  ;;  %v3979_v35 = vor.u32 %v4303_v13, %v3978_v12  ;;  %v3644_v36 = vld [vmem:[%s6546_s3 + $0x4e8] sm:$0xf0] }
 0x2a9   :  { %v3647_v44 = vor.u32 %v4181_v28, %v3644_v36  ;;  %v4101_v52 = vld [vmem:[%s6546_s3 + $0x12c] sm:$0xf]  ;;  %v4263_v28 = vld [vmem:[%s6546_s3 + $0x63c] sm:$0xf] }
 0x2ab   :  { %2485 = vmatpush.bf16.msra.mxu2 %v3311_v56  ;;  %2498 = vmatpush.bf16.msra.mxu3 %v3315_v63  ;;  %v3659_v63 = vor.u32 %v4223_v43, %v3658_v42  ;;  %v4183_v42 = vld [vmem:[%s6546_s3 + $0x3bc] sm:$0xf] }
 0x2ac   :  { %v1969_v5 = vpop.f32.mrf.mxu2  ;;  %v1982_v8 = vpop.f32.mrf.mxu3  ;;  %2524 = vmatpush.bf16.msrb.mxu1 %v3323_v0  ;;  %2563 = vmatpush.bf16.msrb.mxu0 %v3335_v3  ;;  %v3324_v0 = vld [vmem:[%s6546_s3 + $0x268] sm:$0xf0]  ;;  %v3330_v3 = vld [vmem:[%s6546_s3 + $0x130] sm:$0xf]  ;;  %v3660_v43 = vld [vmem:[%s6546_s3 + $0x4f8] sm:$0xf0] }
 0x2ad   :  { %v3338_v5 = vld [vmem:[%s6546_s3 + $0x138] sm:$0xf]  ;;  %v3327_v11 = vor.u32 %v4101_v52, %v3324_v0  ;;  %v3331_v12 = vor.u32 %v4142_v4, %v3330_v3  ;;  %v3340_v0 = vld [vmem:[%s6546_s3 + $0x278] sm:$0xf0] }
 0x2ae   :  { %v4143_v8 = vld [vmem:[%s6546_s3 + $0x274] sm:$0xf0] }
 0x2af   :  { %v6132_v18 = vpop.f32.mrf.mxu1  ;;  %v6134_v19 = vpop.f32.mrf.mxu0  ;;  %v3339_v13 = vor.u32 %v4143_v8, %v3338_v5 }
 0x2b0   :  { %6603 = vst [vmem:[#allocation12_spill] sm:$0xff] %v6132_v18 }
 0x2b1   :  { %6604 = vst [vmem:[#allocation13_spill] sm:$0xff] %v6134_v19  ;;  %4051 = vmatmul.msk.bf16.vlgmr.msrb.gmra.mxu2 %vm28_vm0, %v4702_v38  ;;  %4052 = vmatmul.msk.bf16.vlgmr.msrb.gmra.mxu3 %vm28_vm0, %v4702_v38 }
 0x2b2   :  { %4054 = vmatmul.msk.bf16.vlgmr.msra.gmra.mxu1 %vm28_vm0, %v4702_v38  ;;  %4057 = vmatmul.msk.bf16.vlgmr.msra.gmra.mxu0 %vm28_vm0, %v4702_v38 }
 0x2b3   :  { %2535 = vmatpush.bf16.msrb.mxu2 %v3967_v20  ;;  %2548 = vmatpush.bf16.msrb.mxu3 %v3971_v23 }
 0x2b4   :  { %v6165_v53 = vpop.f32.mrf.mxu2  ;;  %v6167_v56 = vpop.f32.mrf.mxu3  ;;  %2574 = vmatpush.bf16.msra.mxu1 %v3979_v35  ;;  %v3980_v35 = vld [vmem:[%s6546_s3 + $0x778] sm:$0xf0] }
 0x2b5   :  { %v3983_v41 = vor.u32 %v4263_v28, %v3980_v35 }
 0x2b7   :  { %v2060_v9 = vpop.f32.mrf.mxu1  ;;  %v2099_v10 = vpop.f32.mrf.mxu0  ;;  %2536 = vmatpush.bf16.msrb.mxu2 %v3647_v44  ;;  %2549 = vmatpush.bf16.msrb.mxu3 %v3651_v47  ;;  %v3663_v44 = vor.u32 %v4183_v42, %v3660_v43 }
 0x2b8   :  { %2575 = vmatpush.bf16.msra.mxu1 %v3659_v63  ;;  %v4103_v63 = vld [vmem:[%s6546_s3 + $0x13c] sm:$0xf] }
 0x2b9   :  { %v3343_v5 = vor.u32 %v4103_v63, %v3340_v0 }
 0x2bb   :  { %2537 = vmatpush.bf16.msrb.mxu2 %v3327_v11  ;;  %2550 = vmatpush.bf16.msrb.mxu3 %v3331_v12 }
 0x2bc   :  { %v2021_v20 = vpop.f32.mrf.mxu2  ;;  %v2034_v23 = vpop.f32.mrf.mxu3  ;;  %2576 = vmatpush.bf16.msra.mxu1 %v3339_v13 }
 0x2bf   :  { %v6190_v36 = vpop.f32.mrf.mxu1  ;;  %v6192_v40 = vpop.f32.mrf.mxu0 }
 0x2c0   :  { %6605 = vst [vmem:[#allocation14_spill] sm:$0xff] %v6190_v36 }
 0x2c1   :  { %6606 = vst [vmem:[#allocation15_spill] sm:$0xff] %v6192_v40  ;;  %4055 = vmatmul.msk.bf16.vlgmr.msra.gmra.mxu2 %vm28_vm0, %v4702_v38  ;;  %4056 = vmatmul.msk.bf16.vlgmr.msra.gmra.mxu3 %vm28_vm0, %v4702_v38 }
 0x2c2   :  { %4058 = vmatmul.msk.bf16.vlgmr.msrb.gmra.mxu1 %vm28_vm0, %v4702_v38  ;;  %4061 = vmatmul.msk.bf16.vlgmr.msrb.gmra.mxu0 %vm28_vm0, %v4702_v38 }
 0x2c3   :  { %2587 = vmatpush.bf16.msra.mxu2 %v3983_v41 }
 0x2c4   :  { %v6208_v47 = vpop.f32.mrf.mxu2  ;;  %v6210_v52 = vpop.f32.mrf.mxu3 }
 0x2c5   :  { %6607 = vst [vmem:[#allocation16_spill] sm:$0xff] %v6208_v47 }
 0x2c6   :  { %6608 = vst [vmem:[#allocation17_spill] sm:$0xff] %v6210_v52 }
 0x2c7   :  { %v2112_v3 = vpop.f32.mrf.mxu1  ;;  %v2151_v4 = vpop.f32.mrf.mxu0  ;;  %2588 = vmatpush.bf16.msra.mxu2 %v3663_v44 }
 0x2cb   :  { %2589 = vmatpush.bf16.msra.mxu2 %v3343_v5 }
 0x2cc   :  { %v2073_v8 = vpop.f32.mrf.mxu2  ;;  %v2086_v9 = vpop.f32.mrf.mxu3 }
 0x2cf   :  { %v6218_v10 = vpop.f32.mrf.mxu1  ;;  %v6220_v11 = vpop.f32.mrf.mxu0 }
 0x2d0   :  { %6609 = vst [vmem:[#allocation18_spill] sm:$0xff] %v6218_v10 }
 0x2d1   :  { %6610 = vst [vmem:[#allocation19_spill] sm:$0xff] %v6220_v11  ;;  %4059 = vmatmul.msk.bf16.vlgmr.msrb.gmra.mxu2 %vm28_vm0, %v4702_v38  ;;  %4060 = vmatmul.msk.bf16.vlgmr.msrb.gmra.mxu3 %vm28_vm0, %v4702_v38 }
 0x2d2   :  { %4062 = vmatmul.msk.bf16.vlgmr.msra.gmra.mxu1 %vm28_vm0, %v4702_v38 }
 0x2d4   :  { %v6228_v12 = vpop.f32.mrf.mxu2  ;;  %v6230_v13 = vpop.f32.mrf.mxu3 }
 0x2d5   :  { %6611 = vst [vmem:[#allocation20_spill] sm:$0xff] %v6228_v12 }
 0x2d6   :  { %6612 = vst [vmem:[#allocation21_spill] sm:$0xff] %v6230_v13 }
 0x2d7   :  { %v2164_v20 = vpop.f32.mrf.mxu1  ;;  %v2203_v23 = vpop.f32.mrf.mxu0 }
 0x2dc   :  { %v2125_v28 = vpop.f32.mrf.mxu2  ;;  %v2138_v35 = vpop.f32.mrf.mxu3 }
 0x2df   :  { %v6232_v41 = vpop.f32.mrf.mxu1  ;;  %v6234_v42 = vpop.f32.mrf.mxu0 }
 0x2e0   :  { %6613 = vst [vmem:[#allocation22_spill] sm:$0xff] %v6232_v41 }
 0x2e1   :  { %6614 = vst [vmem:[#allocation23_spill] sm:$0xff] %v6234_v42  ;;  %4063 = vmatmul.msk.bf16.vlgmr.msra.gmra.mxu2 %vm28_vm0, %v4702_v38 }
 0x2e4   :  { %v6238_v43 = vpop.f32.mrf.mxu2  ;;  %v6240_v44 = vpop.f32.mrf.mxu3 }
 0x2e5   :  { %6615 = vst [vmem:[#allocation24_spill] sm:$0xff] %v6238_v43 }
 0x2e6   :  { %6616 = vst [vmem:[#allocation25_spill] sm:$0xff] %v6240_v44 }
 0x2e7   :  { %v2216_v63 = vpop.f32.mrf.mxu1  ;;  %v2255_v0 = vpop.f32.mrf.mxu0 }
 0x2ec   :  { %v2177_v3 = vpop.f32.mrf.mxu2  ;;  %v2190_v4 = vpop.f32.mrf.mxu3 }
 0x2ef   :  { %v6242_v5 = vpop.f32.mrf.mxu1  ;;  %v6244_v8 = vpop.f32.mrf.mxu0 }
 0x2f0   :  { %6617 = vst [vmem:[#allocation26_spill] sm:$0xff] %v6242_v5 }
 0x2f1   :  { %6618 = vst [vmem:[#allocation27_spill] sm:$0xff] %v6244_v8 }
 0x2f4   :  { %v6246_v9 = vpop.f32.mrf.mxu2  ;;  %v6248_v20 = vpop.f32.mrf.mxu3 }
 0x2f5   :  { %6619 = vst [vmem:[#allocation28_spill] sm:$0xff] %v6246_v9 }
 0x2f6   :  { %6620 = vst [vmem:[#allocation29_spill] sm:$0xff] %v6248_v20 }
 0x2f7   :  { %v2268_v23 = vpop.f32.mrf.mxu1  ;;  %v2307_v28 = vpop.f32.mrf.mxu0 }
 0x2fc   :  { %v2229_v35 = vpop.f32.mrf.mxu2  ;;  %v2242_v38 = vpop.f32.mrf.mxu3 }
 0x2ff   :  { %v6250_v42 = vpop.f32.mrf.mxu1  ;;  %v6252_v41 = vpop.f32.mrf.mxu0 }
 0x300   :  { %6621 = vst [vmem:[#allocation30_spill] sm:$0xff] %v6250_v42 }
 0x301   :  { %6622 = vst [vmem:[#allocation31_spill] sm:$0xff] %v6252_v41 }
 0x304   :  { %v6254_v63 = vpop.f32.mrf.mxu2  ;;  %v6256_v0 = vpop.f32.mrf.mxu3 }
 0x305   :  { %6623 = vst [vmem:[#allocation32_spill] sm:$0xff] %v6254_v63 }
 0x306   :  { %6624 = vst [vmem:[#allocation33_spill] sm:$0xff] %v6256_v0 }
 0x307   :  { %v2320_v3 = vpop.f32.mrf.mxu1  ;;  %v2359_v4 = vpop.f32.mrf.mxu0 }
 0x30c   :  { %v2281_v5 = vpop.f32.mrf.mxu2  ;;  %v2294_v8 = vpop.f32.mrf.mxu3 }
 0x30f   :  { %v6258_v11 = vpop.f32.mrf.mxu1  ;;  %v6260_v9 = vpop.f32.mrf.mxu0 }
 0x310   :  { %6625 = vst [vmem:[#allocation34_spill] sm:$0xff] %v6258_v11 }
 0x311   :  { %6626 = vst [vmem:[#allocation35_spill] sm:$0xff] %v6260_v9 }
 0x314   :  { %v6262_v23 = vpop.f32.mrf.mxu2  ;;  %v6264_v28 = vpop.f32.mrf.mxu3 }
 0x315   :  { %6627 = vst [vmem:[#allocation36_spill] sm:$0xff] %v6262_v23 }
 0x317   :  { %v2372_v35 = vpop.f32.mrf.mxu1  ;;  %v2411_v38 = vpop.f32.mrf.mxu0 }
 0x31c   :  { %v2333_v42 = vpop.f32.mrf.mxu2  ;;  %v2346_v41 = vpop.f32.mrf.mxu3 }
 0x31f   :  { %v6266_v20 = vpop.f32.mrf.mxu1  ;;  %v6268_v63 = vpop.f32.mrf.mxu0 }
 0x320   :  { %6628 = vst [vmem:[#allocation37_spill] sm:$0xff] %v6266_v20 }
 0x321   :  { %6629 = vst [vmem:[#allocation38_spill] sm:$0xff] %v6268_v63 }
 0x324   :  { %v6270_v3 = vpop.f32.mrf.mxu2  ;;  %v6272_v5 = vpop.f32.mrf.mxu3 }
 0x325   :  { %6630 = vst [vmem:[#allocation39_spill] sm:$0xff] %v6270_v3  ;;  %v2595_v3 = vmax.f32 %v5388_v33, %v5478_v17 }
 0x326   :  { %6631 = vst [vmem:[#allocation40_spill] sm:$0xff] %v6272_v5 }
 0x327   :  { %v2424_v8 = vpop.f32.mrf.mxu1  ;;  %v2463_v4 = vpop.f32.mrf.mxu0 }
 0x328   :  { %v2598_v4 = vmax.f32 %v5476_v14, %v5564_v1 }
 0x32c   :  { %v2385_v11 = vpop.f32.mrf.mxu2  ;;  %v2398_v9 = vpop.f32.mrf.mxu3 }
 0x32d   :  { %v2596_v11 = vmax.f32 %v5390_v34, %v5348_v16  ;;  %v2597_v9 = vmax.f32 %v5346_v15, %v5434_v60 }
 0x32f   :  { %v6274_v0 = vpop.f32.mrf.mxu1  ;;  %v6276_v23 = vpop.f32.mrf.mxu0 }
 0x330   :  { %6632 = vst [vmem:[#allocation41_spill] sm:$0xff] %v6274_v0 }
 0x334   :  { %v6278_v35 = vpop.f32.mrf.mxu2  ;;  %v6280_v42 = vpop.f32.mrf.mxu3 }
 0x337   :  { %v2476_v41 = vpop.f32.mrf.mxu1  ;;  %v2515_v38 = vpop.f32.mrf.mxu0 }
 0x338   :  { %v2599_v41 = vmax.f32 %v2595_v3, %v5566_v2  ;;  %v2602_v38 = vmax.f32 %v2598_v4, %v5652_v54 }
 0x33a   :  { %v2603_v17 = vmax.f32 %v2599_v41, %v5654_v55  ;;  %v2606_v1 = vmax.f32 %v2602_v38, %v5740_v49 }
 0x33c   :  { %v2437_v20 = vpop.f32.mrf.mxu2  ;;  %v2450_v63 = vpop.f32.mrf.mxu3  ;;  %v2607_v3 = vmax.f32 %v2603_v17, %v5742_v50  ;;  %v2610_v4 = vmax.f32 %v2606_v1, %v5828_v48 }
 0x33d   :  { %v2600_v20 = vmax.f32 %v2596_v11, %v5436_v61  ;;  %v2601_v63 = vmax.f32 %v2597_v9, %v5522_v45 }
 0x33e   :  { %v2611_v41 = vmax.f32 %v2607_v3, %v5830_v51 }
 0x33f   :  { %v6284_v5 = vpop.f32.mrf.mxu1  ;;  %v6286_v8 = vpop.f32.mrf.mxu0  ;;  %v2604_v16 = vmax.f32 %v2600_v20, %v5524_v46  ;;  %v2605_v60 = vmax.f32 %v2601_v63, %v5610_v31  ;;  %v2614_v63 = vmax.f32 %v2610_v4, %v5916_v57 }
 0x340   :  { %6633 = vst [vmem:[#allocation42_spill] sm:$0xff] %v6286_v8  ;;  %v2615_v38 = vmax.f32 %v2611_v41, %v5918_v58 }
 0x341   :  { %v2608_v11 = vmax.f32 %v2604_v16, %v5612_v32  ;;  %v2609_v9 = vmax.f32 %v2605_v60, %v5698_v24  ;;  %v2618_v60 = vmax.f32 %v2614_v63, %v6004_v6 }
 0x342   :  { %v2619_v1 = vmax.f32 %v2615_v38, %v6006_v7 }
 0x343   :  { %v2612_v45 = vmax.f32 %v2608_v11, %v5700_v25  ;;  %v2613_v20 = vmax.f32 %v2609_v9, %v5786_v21  ;;  %v2622_v11 = vmax.f32 %v2618_v60, %v6092_v29 }
 0x344   :  { %v6299_v33 = vpop.f32.mrf.mxu2  ;;  %v6301_v8 = vpop.f32.mrf.mxu3  ;;  %v2623_v9 = vmax.f32 %v2619_v1, %v6094_v30 }
 0x345   :  { %6634 = vst [vmem:[#allocation43_spill] sm:$0xff] %v6299_v33  ;;  %v2616_v17 = vmax.f32 %v2612_v45, %v5788_v22  ;;  %v2617_v16 = vmax.f32 %v2613_v20, %v5874_v26  ;;  %v2626_v41 = vmax.f32 %v2622_v11, %v6165_v53 }
 0x346   :  { %v2627_v20 = vmax.f32 %v2623_v9, %v6167_v56 }
 0x347   :  { %v2528_v55 = vpop.f32.mrf.mxu1  ;;  %v2567_v54 = vpop.f32.mrf.mxu0 }
 0x348   :  { %v2620_v54 = vmax.f32 %v2616_v17, %v5876_v27  ;;  %v2621_v55 = vmax.f32 %v2617_v16, %v5962_v37  ;;  %v2630_v17 = vmax.f32 %v2626_v41, %v6208_v47  ;;  %v2631_v16 = vmax.f32 %v2627_v20, %v6210_v52  ;;  %v6636_v20 = vld [vmem:[#allocation19_spill] sm:$0xff] }
 0x349   :  { %v6640_v52 = vld [vmem:[#allocation23_spill] sm:$0xff] }
 0x34a   :  { %v2624_v4 = vmax.f32 %v2620_v54, %v5964_v39  ;;  %v2625_v45 = vmax.f32 %v2621_v55, %v6050_v59  ;;  %v2635_v54 = vmax.f32 %v2631_v16, %v6230_v13 }
 0x34c   :  { %v2489_v48 = vpop.f32.mrf.mxu2  ;;  %v2502_v3 = vpop.f32.mrf.mxu3  ;;  %v2629_v38 = vmax.f32 %v2625_v45, %v6132_v18  ;;  %v2639_v41 = vmax.f32 %v2635_v54, %v6240_v44  ;;  %v6641_v18 = vld [vmem:[#allocation26_spill] sm:$0xff] }
 0x34d   :  { %v2628_v48 = vmax.f32 %v2624_v4, %v6052_v62  ;;  %v2634_v3 = vmax.f32 %v2630_v17, %v6228_v12  ;;  %v6639_v12 = vld [vmem:[#allocation29_spill] sm:$0xff]  ;;  %v6645_v54 = vld [vmem:[#allocation30_spill] sm:$0xff] }
 0x34e   :  { %v2633_v1 = vmax.f32 %v2629_v38, %v6190_v36  ;;  %v6638_v36 = vld [vmem:[#allocation28_spill] sm:$0xff]  ;;  %v2643_v16 = vmax.f32 %v2639_v41, %v6639_v12  ;;  %v6647_v41 = vld [vmem:[#allocation31_spill] sm:$0xff]  ;;  %v6648_v12 = vld [vmem:[#allocation34_spill] sm:$0xff] }
 0x34f   :  { %v6327_v63 = vpop.f32.mrf.mxu1  ;;  %v2632_v60 = vmax.f32 %v2628_v48, %v6134_v19  ;;  %v2638_v45 = vmax.f32 %v2634_v3, %v6238_v43  ;;  %v6637_v19 = vld [vmem:[#allocation22_spill] sm:$0xff]  ;;  %v6644_v3 = vld [vmem:[#allocation27_spill] sm:$0xff] }
 0x350   :  { %v2637_v4 = vmax.f32 %v2633_v1, %v6218_v10  ;;  %v6643_v1 = vld [vmem:[#allocation33_spill] sm:$0xff] }
 0x351   :  { %v2636_v9 = vmax.f32 %v2632_v60, %v6192_v40  ;;  %v2642_v17 = vmax.f32 %v2638_v45, %v6638_v36  ;;  %v6642_v60 = vld [vmem:[#allocation32_spill] sm:$0xff]  ;;  %v2647_v10 = vmax.f32 %v2643_v16, %v6643_v1  ;;  %v6652_v1 = vld [vmem:[#allocation37_spill] sm:$0xff] }
 0x352   :  { %v2641_v38 = vmax.f32 %v2637_v4, %v6637_v19 }
 0x353   :  { %v2640_v48 = vmax.f32 %v2636_v9, %v6636_v20  ;;  %v2646_v40 = vmax.f32 %v2642_v17, %v6642_v60  ;;  %v6646_v9 = vld [vmem:[#allocation36_spill] sm:$0xff]  ;;  %v2651_v4 = vmax.f32 %v2647_v10, %v6264_v28  ;;  %v6651_v60 = vld [vmem:[#allocation35_spill] sm:$0xff] }
 0x354   :  { %v6337_v55 = vpop.f32.mrf.mxu2  ;;  %v6339_v11 = vpop.f32.mrf.mxu3  ;;  %v2645_v62 = vmax.f32 %v2641_v38, %v6641_v18  ;;  %v6650_v18 = vld [vmem:[#allocation40_spill] sm:$0xff] }
 0x355   :  { %6635 = vst [vmem:[#allocation44_spill] sm:$0xff] %v6339_v11  ;;  %v2644_v47 = vmax.f32 %v2640_v48, %v6640_v52  ;;  %v2650_v20 = vmax.f32 %v2646_v40, %v6646_v9  ;;  %v6649_v52 = vld [vmem:[#allocation39_spill] sm:$0xff]  ;;  %v2655_v17 = vmax.f32 %v2651_v4, %v6650_v18  ;;  %v6653_v9 = vld [vmem:[#allocation38_spill] sm:$0xff] }
 0x356   :  { %v2649_v44 = vmax.f32 %v2645_v62, %v6645_v54 }
 0x357   :  { %v2580_v13 = vpop.f32.mrf.mxu1  ;;  %v2648_v43 = vmax.f32 %v2644_v47, %v6644_v3  ;;  %v2654_v38 = vmax.f32 %v2650_v20, %v6649_v52  ;;  %v2659_v40 = vmax.f32 %v2655_v17, %v6280_v42 }
 0x358   :  { %v2653_v48 = vmax.f32 %v2649_v44, %v6648_v12 }
 0x359   :  { %v2652_v13 = vmax.f32 %v2648_v43, %v6647_v41  ;;  %v2658_v62 = vmax.f32 %v2654_v38, %v6278_v35  ;;  %v2663_v44 = vmax.f32 %v2659_v40, %v6301_v8  ;;  %v6655_v38 = vld [vmem:[#allocation42_spill] sm:$0xff] }
 0x35a   :  { %v2657_v47 = vmax.f32 %v2653_v48, %v6652_v1 }
 0x35b   :  { %v2656_v16 = vmax.f32 %v2652_v13, %v6651_v60  ;;  %v2662_v43 = vmax.f32 %v2658_v62, %v6299_v33  ;;  %v2667_v13 = vmax.f32 %v2663_v44, %v6339_v11 }
 0x35c   :  { %v2541_v45 = vpop.f32.mrf.mxu2  ;;  %v2554_v36 = vpop.f32.mrf.mxu3 }
 0x35d   :  { %v2660_v10 = vmax.f32 %v2656_v16, %v6653_v9  ;;  %v2661_v36 = vmax.f32 %v2657_v47, %v6274_v0  ;;  %v2666_v45 = vmax.f32 %v2662_v43, %v6337_v55 }
 0x35f   :  { %v2664_v20 = vmax.f32 %v2660_v10, %v6276_v23  ;;  %v2665_v4 = vmax.f32 %v2661_v36, %v6284_v5  ;;  %v6656_v36 = vld [vmem:[#allocation3_spill] sm:$0xff] }
 0x361   :  { %v2668_v17 = vmax.f32 %v2664_v20, %v6655_v38  ;;  %v2669_v16 = vmax.f32 %v2665_v4, %v6327_v63 }
 0x363   :  { %v2671_v0 = vmax.f32 %v2667_v13, %v2668_v17  ;;  %v6658_v17 = vld [vmem:[#allocation2_spill] sm:$0xff] }
 0x364   :  { %v6373_v48 = vpop.f32.mrf.mxu2 }
 0x365   :  { %6654 = vst [vmem:[#allocation22_spill] sm:$0xff] %v6373_v48  ;;  %v2670_v47 = vmax.f32 %v2666_v45, %v6373_v48 }
 0x367   :  { %v2672_v62 = vmax.f32 %v2669_v16, %v2670_v47 }
 0x369   :  { %v2673_v33 = vmax.f32 %v2671_v0, %v2672_v62 }
 0x36b   :  { %2674 = vmax.xlane.f32.xlu1 %v2673_v33  ;;  %v6657_v33 = vld [vmem:[#allocation5_spill] sm:$0xff] }
 0x36c   :  { %v2593_v40 = vpop.f32.mrf.mxu2 }
 0x3de   :  { %v6378_v10 = vpop.xlane.xlu1 %2674 }
 0x3df   :  { %v2676_v43 = vsub.f32 %v6656_v36, %v6378_v10  ;;  %v2677_v44 = vsub.f32 %v5390_v34, %v6378_v10  ;;  %v2678_v20 = vsub.f32 %v5346_v15, %v6378_v10  ;;  %v2679_v45 = vsub.f32 %v5476_v14, %v6378_v10  ;;  %v6659_v34 = vld [vmem:[#allocation4_spill] sm:$0xff] }
 0x3e0   :  { %v2680_v0 = vsub.f32 %v6657_v33, %v6378_v10  ;;  %v2681_v16 = vsub.f32 %v6658_v17, %v6378_v10  ;;  %v2682_v62 = vsub.f32 %v6659_v34, %v6378_v10  ;;  %v6661_v34 = vld [vmem:[#allocation6_spill] sm:$0xff] }
 0x3e1   :  { %v2756_v11 = vmul.f32 1.442695, %v2676_v43  ;;  %v2758_v4 = vmul.f32 1.442695, %v2677_v44  ;;  %v2760_v13 = vmul.f32 1.442695, %v2678_v20  ;;  %v2684_v44 = vsub.f32 %v5566_v2, %v6378_v10 }
 0x3e2   :  { %v2762_v47 = vmul.f32 1.442695, %v2679_v45  ;;  %v2764_v40 = vmul.f32 1.442695, %v2680_v0  ;;  %v6660_v43 = vld [vmem:[#allocation7_spill] sm:$0xff]  ;;  %v2685_v45 = vsub.f32 %v5436_v61, %v6378_v10  ;;  %v2686_v48 = vsub.f32 %v6661_v34, %v6378_v10  ;;  %v6662_v2 = vld [vmem:[#allocation8_spill] sm:$0xff] }
 0x3e3   :  { %4308 = vpow2.f32 %v2756_v11  ;;  %v2683_v14 = vsub.f32 %v6660_v43, %v6378_v10  ;;  %v2766_v11 = vmul.f32 1.442695, %v2681_v16  ;;  %v2768_v20 = vmul.f32 1.442695, %v2682_v62  ;;  %v6663_v61 = vld [vmem:[#allocation9_spill] sm:$0xff] }
 0x3e4   :  { %4310 = vpow2.f32 %v2758_v4  ;;  %v2774_v62 = vmul.f32 1.442695, %v2685_v45 }
 0x3e5   :  { %4312 = vpow2.f32 %v2760_v13  ;;  %v2770_v13 = vmul.f32 1.442695, %v2683_v14  ;;  %v2776_v14 = vmul.f32 1.442695, %v2686_v48 }
 0x3e6   :  { %4314 = vpow2.f32 %v2762_v47  ;;  %v2772_v47 = vmul.f32 1.442695, %v2684_v44 }
 0x3e7   :  { %4316 = vpow2.f32 %v2764_v40  ;;  %v2687_v40 = vsub.f32 %v6662_v2, %v6378_v10 }
 0x3e8   :  { %4318 = vpow2.f32 %v2766_v11  ;;  %v2688_v11 = vsub.f32 %v6663_v61, %v6378_v10 }
 0x3e9   :  { %v4309_v15 = vpop.eup %4308  ;;  %4320 = vpow2.f32 %v2768_v20  ;;  %v2689_v20 = vsub.f32 %v5524_v46, %v6378_v10  ;;  %v2778_v44 = vmul.f32 1.442695, %v2687_v40  ;;  %v2692_v46 = vsub.f32 %v5742_v50, %v6378_v10  ;;  %v6664_v50 = vld [vmem:[#allocation10_spill] sm:$0xff] }
 0x3ea   :  { %v4311_v36 = vpop.eup %4310  ;;  %4322 = vpow2.f32 %v2770_v13  ;;  %v2690_v13 = vsub.f32 %v5610_v31, %v6378_v10  ;;  %v2780_v45 = vmul.f32 1.442695, %v2688_v11  ;;  %v2693_v31 = vsub.f32 %v5612_v32, %v6378_v10 }
 0x3eb   :  { %v2916_v4 = vadd.f32 %v4311_v36, %v4309_v15  ;;  %v4313_v33 = vpop.eup %4312  ;;  %4324 = vpow2.f32 %v2772_v47  ;;  %v2691_v47 = vsub.f32 %v5740_v49, %v6378_v10  ;;  %v2782_v48 = vmul.f32 1.442695, %v2689_v20 }
 0x3ec   :  { %v4315_v17 = vpop.eup %4314  ;;  %4326 = vpow2.f32 %v2774_v62  ;;  %v2784_v40 = vmul.f32 1.442695, %v2690_v13  ;;  %v2694_v49 = vsub.f32 %v5698_v24, %v6378_v10  ;;  %v2695_v20 = vsub.f32 %v6664_v50, %v6378_v10 }
 0x3ed   :  { %v2917_v0 = vadd.f32 %v4313_v33, %v2916_v4  ;;  %v4317_v43 = vpop.eup %4316  ;;  %4328 = vpow2.f32 %v2776_v14  ;;  %v2788_v14 = vmul.f32 1.442695, %v2692_v46  ;;  %v2696_v32 = vsub.f32 %v5830_v51, %v6378_v10 }
 0x3ee   :  { %v4319_v36 = vpop.eup %4318  ;;  %4330 = vpow2.f32 %v2778_v44  ;;  %v2790_v44 = vmul.f32 1.442695, %v2693_v31  ;;  %v2792_v13 = vmul.f32 1.442695, %v2694_v49  ;;  %v2697_v24 = vsub.f32 %v5700_v25, %v6378_v10 }
 0x3ef   :  { %v2918_v16 = vadd.f32 %v4315_v17, %v2917_v0  ;;  %v4321_v33 = vpop.eup %4320  ;;  %4332 = vpow2.f32 %v2780_v45  ;;  %v2699_v51 = vsub.f32 %v5916_v57, %v6378_v10  ;;  %v2700_v25 = vsub.f32 %v5918_v58, %v6378_v10 }
 0x3f0   :  { %v4323_v17 = vpop.eup %4322  ;;  %4334 = vpow2.f32 %v2782_v48  ;;  %v2702_v57 = vsub.f32 %v5874_v26, %v6378_v10  ;;  %v2703_v58 = vsub.f32 %v6004_v6, %v6378_v10  ;;  %v2705_v26 = vsub.f32 %v5876_v27, %v6378_v10 }
 0x3f1   :  { %v2919_v15 = vadd.f32 %v4317_v43, %v2918_v16  ;;  %v4325_v16 = vpop.eup %4324  ;;  %4336 = vpow2.f32 %v2784_v40  ;;  %v2802_v49 = vmul.f32 1.442695, %v2699_v51  ;;  %v2706_v6 = vsub.f32 %v5962_v37, %v6378_v10 }
 0x3f2   :  { %v4327_v2 = vpop.eup %4326  ;;  %v2708_v27 = vsub.f32 %v6094_v30, %v6378_v10  ;;  %v2709_v37 = vsub.f32 %v5964_v39, %v6378_v10  ;;  %v2711_v30 = vsub.f32 %v6165_v53, %v6378_v10  ;;  %v2712_v39 = vsub.f32 %v6167_v56, %v6378_v10  ;;  %v6666_v53 = vld [vmem:[#allocation12_spill] sm:$0xff] }
 0x3f3   :  { %v2920_v4 = vadd.f32 %v4319_v36, %v2919_v15  ;;  %v4329_v15 = vpop.eup %4328  ;;  %v2786_v36 = vmul.f32 1.442695, %v2691_v47  ;;  %v2816_v51 = vmul.f32 1.442695, %v2706_v6  ;;  %v6667_v56 = vld [vmem:[#allocation16_spill] sm:$0xff] }
 0x3f4   :  { %v4331_v11 = vpop.eup %4330 }
 0x3f5   :  { %v2921_v0 = vadd.f32 %v4321_v33, %v2920_v4  ;;  %v4333_v33 = vpop.eup %4332  ;;  %4338 = vpow2.f32 %v2786_v36 }
 0x3f6   :  { %4340 = vpow2.f32 %v2788_v14 }
 0x3f7   :  { %v2922_v34 = vadd.f32 %v4323_v17, %v2921_v0  ;;  %v4335_v17 = vpop.eup %4334  ;;  %4342 = vpow2.f32 %v2790_v44 }
 0x3f8   :  { %4344 = vpow2.f32 %v2792_v13 }
 0x3f9   :  { %v2923_v43 = vadd.f32 %v4325_v16, %v2922_v34  ;;  %v4337_v34 = vpop.eup %4336  ;;  %v2794_v16 = vmul.f32 1.442695, %v2695_v20 }
 0x3fb   :  { %v2924_v62 = vadd.f32 %v4327_v2, %v2923_v43  ;;  %v4339_v48 = vpop.eup %4338  ;;  %v2698_v43 = vsub.f32 %v5786_v21, %v6378_v10  ;;  %v2796_v2 = vmul.f32 1.442695, %v2696_v32  ;;  %4346 = vpow2.f32 %v2794_v16 }
 0x3fc   :  { %v4341_v40 = vpop.eup %4340  ;;  %v2701_v21 = vsub.f32 %v5788_v22, %v6378_v10  ;;  %v2704_v22 = vsub.f32 %v6006_v7, %v6378_v10  ;;  %v2808_v32 = vmul.f32 1.442695, %v2702_v57  ;;  %v2707_v7 = vsub.f32 %v6092_v29, %v6378_v10 }
 0x3fd   :  { %v2925_v61 = vadd.f32 %v4329_v15, %v2924_v62  ;;  %v2798_v62 = vmul.f32 1.442695, %v2697_v24  ;;  %v4343_v31 = vpop.eup %4342  ;;  %4348 = vpow2.f32 %v2796_v2  ;;  %v2800_v36 = vmul.f32 1.442695, %v2698_v43 }
 0x3fe   :  { %v2806_v44 = vmul.f32 1.442695, %v2701_v21  ;;  %v2814_v2 = vmul.f32 1.442695, %v2705_v26  ;;  %v2710_v29 = vsub.f32 %v6050_v59, %v6378_v10  ;;  %v6665_v59 = vld [vmem:[#allocation11_spill] sm:$0xff] }
 0x3ff   :  { %v2926_v4 = vadd.f32 %v4331_v11, %v2925_v61  ;;  %v4345_v11 = vpop.eup %4344  ;;  %4350 = vpow2.f32 %v2798_v62 }
 0x400   :  { %4352 = vpow2.f32 %v2800_v36  ;;  %v2824_v57 = vmul.f32 1.442695, %v2710_v29 }
 0x401   :  { %v2927_v0 = vadd.f32 %v4333_v33, %v2926_v4  ;;  %v4347_v4 = vpop.eup %4346  ;;  %v2804_v33 = vmul.f32 1.442695, %v2700_v25  ;;  %4354 = vpow2.f32 %v2802_v49  ;;  %v2822_v49 = vmul.f32 1.442695, %v2709_v37 }
 0x403   :  { %v2928_v45 = vadd.f32 %v4335_v17, %v2927_v0  ;;  %v4349_v20 = vpop.eup %4348  ;;  %4356 = vpow2.f32 %v2804_v33 }
 0x404   :  { %4358 = vpow2.f32 %v2806_v44 }
 0x405   :  { %v2929_v47 = vadd.f32 %v4337_v34, %v2928_v45  ;;  %v4351_v17 = vpop.eup %4350  ;;  %v2810_v34 = vmul.f32 1.442695, %v2703_v58  ;;  %4360 = vpow2.f32 %v2808_v32  ;;  %v2826_v58 = vmul.f32 1.442695, %v2711_v30 }
 0x406   :  { %v4353_v45 = vpop.eup %4352 }
 0x407   :  { %v2930_v46 = vadd.f32 %v4339_v48, %v2929_v47  ;;  %v4355_v16 = vpop.eup %4354  ;;  %v2812_v47 = vmul.f32 1.442695, %v2704_v22  ;;  %4362 = vpow2.f32 %v2810_v34  ;;  %v2828_v22 = vmul.f32 1.442695, %v2712_v39  ;;  %v6673_v39 = vld [vmem:[#allocation15_spill] sm:$0xff] }
 0x409   :  { %v2931_v15 = vadd.f32 %v4341_v40, %v2930_v46  ;;  %v4357_v43 = vpop.eup %4356  ;;  %4364 = vpow2.f32 %v2812_v47 }
 0x40a   :  { %v4359_v40 = vpop.eup %4358  ;;  %4366 = vpow2.f32 %v2814_v2 }
 0x40b   :  { %v2932_v61 = vadd.f32 %v4343_v31, %v2931_v15  ;;  %v4361_v15 = vpop.eup %4360  ;;  %v2818_v31 = vmul.f32 1.442695, %v2707_v7  ;;  %4368 = vpow2.f32 %v2816_v51  ;;  %v6669_v7 = vld [vmem:[#allocation13_spill] sm:$0xff]  ;;  %v6670_v51 = vld [vmem:[#allocation14_spill] sm:$0xff] }
 0x40c   :  { %v2717_v2 = vsub.f32 %v6669_v7, %v6378_v10 }
 0x40d   :  { %v2933_v14 = vadd.f32 %v4345_v11, %v2932_v61  ;;  %v4363_v36 = vpop.eup %4362  ;;  %v2820_v61 = vmul.f32 1.442695, %v2708_v27  ;;  %4370 = vpow2.f32 %v2818_v31 }
 0x40e   :  { %v2838_v29 = vmul.f32 1.442695, %v2717_v2  ;;  %v2726_v2 = vsub.f32 %v6637_v19, %v6378_v10  ;;  %v6680_v19 = vld [vmem:[#allocation23_spill] sm:$0xff] }
 0x40f   :  { %v2934_v50 = vadd.f32 %v4347_v4, %v2933_v14  ;;  %v4365_v21 = vpop.eup %4364  ;;  %4372 = vpow2.f32 %v2820_v61 }
 0x410   :  { %v4367_v4 = vpop.eup %4366  ;;  %4374 = vpow2.f32 %v2822_v49 }
 0x411   :  { %v2935_v0 = vadd.f32 %v4349_v20, %v2934_v50  ;;  %v4369_v50 = vpop.eup %4368  ;;  %v2713_v20 = vsub.f32 %v6665_v59, %v6378_v10  ;;  %4376 = vpow2.f32 %v2824_v57  ;;  %v2721_v57 = vsub.f32 %v6673_v39, %v6378_v10 }
 0x412   :  { %4378 = vpow2.f32 %v2826_v58 }
 0x413   :  { %v2936_v13 = vadd.f32 %v4351_v17, %v2935_v0  ;;  %v4371_v0 = vpop.eup %4370  ;;  %v2714_v17 = vsub.f32 %v6666_v53, %v6378_v10  ;;  %v2830_v26 = vmul.f32 1.442695, %v2713_v20  ;;  %4380 = vpow2.f32 %v2828_v22  ;;  %v6674_v20 = vld [vmem:[#allocation18_spill] sm:$0xff] }
 0x414   :  { %v2722_v58 = vsub.f32 %v6674_v20, %v6378_v10 }
 0x415   :  { %v2937_v24 = vadd.f32 %v4353_v45, %v2936_v13  ;;  %v4373_v13 = vpop.eup %4372  ;;  %v2715_v45 = vsub.f32 %v6667_v56, %v6378_v10  ;;  %v2832_v47 = vmul.f32 1.442695, %v2714_v17  ;;  %4382 = vpow2.f32 %v2830_v26  ;;  %v6675_v17 = vld [vmem:[#allocation24_spill] sm:$0xff] }
 0x416   :  { %v2723_v22 = vsub.f32 %v6675_v17, %v6378_v10 }
 0x417   :  { %v2938_v48 = vadd.f32 %v4355_v16, %v2937_v24  ;;  %v4375_v24 = vpop.eup %4374  ;;  %v6668_v16 = vld [vmem:[#allocation17_spill] sm:$0xff]  ;;  %4384 = vpow2.f32 %v2832_v47 }
 0x418   :  { %v2716_v6 = vsub.f32 %v6668_v16, %v6378_v10 }
 0x419   :  { %v2939_v46 = vadd.f32 %v4357_v43, %v2938_v48  ;;  %v4377_v43 = vpop.eup %4376 }
 0x41a   :  { %v4379_v27 = vpop.eup %4378 }
 0x41b   :  { %v2940_v62 = vadd.f32 %v4359_v40, %v2939_v46  ;;  %v2834_v46 = vmul.f32 1.442695, %v2715_v45  ;;  %v4381_v31 = vpop.eup %4380  ;;  %v6676_v45 = vld [vmem:[#allocation25_spill] sm:$0xff] }
 0x41c   :  { %v2724_v26 = vsub.f32 %v6676_v45, %v6378_v10 }
 0x41d   :  { %v2941_v25 = vadd.f32 %v4361_v15, %v2940_v62  ;;  %v2718_v62 = vsub.f32 %v6670_v51, %v6378_v10  ;;  %v2836_v15 = vmul.f32 1.442695, %v2716_v6  ;;  %4386 = vpow2.f32 %v2834_v46  ;;  %v6677_v6 = vld [vmem:[#allocation19_spill] sm:$0xff]  ;;  %v6678_v51 = vld [vmem:[#allocation28_spill] sm:$0xff] }
 0x41e   :  { %v2725_v47 = vsub.f32 %v6677_v6, %v6378_v10  ;;  %v2852_v46 = vmul.f32 1.442695, %v2724_v26 }
 0x41f   :  { %v2942_v11 = vadd.f32 %v4363_v36, %v2941_v25  ;;  %v6671_v25 = vld [vmem:[#allocation20_spill] sm:$0xff]  ;;  %4388 = vpow2.f32 %v2836_v15  ;;  %v2840_v49 = vmul.f32 1.442695, %v2718_v62  ;;  %v2727_v62 = vsub.f32 %v6678_v51, %v6378_v10 }
 0x420   :  { %v2719_v36 = vsub.f32 %v6671_v25, %v6378_v10  ;;  %4390 = vpow2.f32 %v2838_v29  ;;  %v2854_v15 = vmul.f32 1.442695, %v2725_v47  ;;  %v6679_v25 = vld [vmem:[#allocation29_spill] sm:$0xff]  ;;  %v2856_v29 = vmul.f32 1.442695, %v2726_v2 }
 0x421   :  { %v2943_v14 = vadd.f32 %v4365_v21, %v2942_v11  ;;  %v4383_v11 = vpop.eup %4382  ;;  %v6672_v21 = vld [vmem:[#allocation21_spill] sm:$0xff]  ;;  %4392 = vpow2.f32 %v2840_v49 }
 0x422   :  { %v2720_v30 = vsub.f32 %v6672_v21, %v6378_v10  ;;  %v2729_v21 = vsub.f32 %v6680_v19, %v6378_v10 }
 0x423   :  { %v2944_v33 = vadd.f32 %v4367_v4, %v2943_v14  ;;  %v4385_v4 = vpop.eup %4384 }
 0x424   :  { %v4387_v59 = vpop.eup %4386 }
 0x425   :  { %v2945_v44 = vadd.f32 %v4369_v50, %v2944_v33  ;;  %v2842_v33 = vmul.f32 1.442695, %v2719_v36  ;;  %v4389_v53 = vpop.eup %4388  ;;  %v2728_v36 = vsub.f32 %v6679_v25, %v6378_v10 }
 0x426   :  { %v4391_v56 = vpop.eup %4390 }
 0x427   :  { %v2946_v32 = vadd.f32 %v4371_v0, %v2945_v44  ;;  %v2844_v44 = vmul.f32 1.442695, %v2720_v30  ;;  %4394 = vpow2.f32 %v2842_v33  ;;  %v4393_v16 = vpop.eup %4392  ;;  %v2858_v30 = vmul.f32 1.442695, %v2727_v62 }
 0x429   :  { %v2947_v34 = vadd.f32 %v4373_v13, %v2946_v32  ;;  %v2846_v32 = vmul.f32 1.442695, %v2721_v57  ;;  %4396 = vpow2.f32 %v2844_v44  ;;  %v2860_v57 = vmul.f32 1.442695, %v2728_v36 }
 0x42b   :  { %v2948_v48 = vadd.f32 %v4375_v24, %v2947_v34  ;;  %v2848_v34 = vmul.f32 1.442695, %v2722_v58  ;;  %4398 = vpow2.f32 %v2846_v32  ;;  %v2862_v58 = vmul.f32 1.442695, %v2729_v21 }
 0x42d   :  { %v2949_v40 = vadd.f32 %v4377_v43, %v2948_v48  ;;  %v2850_v48 = vmul.f32 1.442695, %v2723_v22  ;;  %v4395_v7 = vpop.eup %4394  ;;  %4400 = vpow2.f32 %v2848_v34 }
 0x42f   :  { %v2950_v37 = vadd.f32 %v4379_v27, %v2949_v40  ;;  %v4397_v27 = vpop.eup %4396  ;;  %4402 = vpow2.f32 %v2850_v48  ;;  %v6684_v48 = vld [vmem:[#allocation36_spill] sm:$0xff] }
 0x430   :  { %4404 = vpow2.f32 %v2852_v46 }
 0x431   :  { %v2951_v61 = vadd.f32 %v4381_v31, %v2950_v37  ;;  %v4399_v31 = vpop.eup %4398  ;;  %4406 = vpow2.f32 %v2854_v15 }
 0x432   :  { %4408 = vpow2.f32 %v2856_v29 }
 0x433   :  { %v2952_v14 = vadd.f32 %v4383_v11, %v2951_v61  ;;  %v4401_v11 = vpop.eup %4400  ;;  %4410 = vpow2.f32 %v2858_v30 }
 0x434   :  { %4412 = vpow2.f32 %v2860_v57 }
 0x435   :  { %v2953_v50 = vadd.f32 %v4385_v4, %v2952_v14  ;;  %v4403_v14 = vpop.eup %4402  ;;  %v6681_v4 = vld [vmem:[#allocation26_spill] sm:$0xff]  ;;  %4414 = vpow2.f32 %v2862_v58 }
 0x436   :  { %v2730_v39 = vsub.f32 %v6681_v4, %v6378_v10 }
 0x437   :  { %v2954_v0 = vadd.f32 %v4387_v59, %v2953_v50  ;;  %v4405_v50 = vpop.eup %4404  ;;  %v6682_v59 = vld [vmem:[#allocation32_spill] sm:$0xff] }
 0x438   :  { %v2731_v20 = vsub.f32 %v6682_v59, %v6378_v10  ;;  %v2864_v22 = vmul.f32 1.442695, %v2730_v39 }
 0x439   :  { %v2955_v13 = vadd.f32 %v4389_v53, %v2954_v0  ;;  %v4407_v0 = vpop.eup %4406  ;;  %v6683_v53 = vld [vmem:[#allocation33_spill] sm:$0xff] }
 0x43a   :  { %v2732_v17 = vsub.f32 %v6683_v53, %v6378_v10  ;;  %v2866_v45 = vmul.f32 1.442695, %v2731_v20  ;;  %4416 = vpow2.f32 %v2864_v22 }
 0x43b   :  { %v2956_v24 = vadd.f32 %v4391_v56, %v2955_v13  ;;  %v4409_v13 = vpop.eup %4408  ;;  %v2733_v56 = vsub.f32 %v6644_v3, %v6378_v10  ;;  %v2736_v3 = vsub.f32 %v6264_v28, %v6378_v10  ;;  %v2739_v28 = vsub.f32 %v6649_v52, %v6378_v10 }
 0x43c   :  { %v4411_v34 = vpop.eup %4410  ;;  %4418 = vpow2.f32 %v2866_v45  ;;  %v2742_v52 = vsub.f32 %v6652_v1, %v6378_v10  ;;  %v2745_v1 = vsub.f32 %v6653_v9, %v6378_v10  ;;  %v2748_v9 = vsub.f32 %v6301_v8, %v6378_v10 }
 0x43d   :  { %v2957_v43 = vadd.f32 %v4393_v16, %v2956_v24  ;;  %v2734_v24 = vsub.f32 %v6645_v54, %v6378_v10  ;;  %v2868_v16 = vmul.f32 1.442695, %v2732_v17  ;;  %v4413_v47 = vpop.eup %4412  ;;  %v2737_v54 = vsub.f32 %v6647_v41, %v6378_v10 }
 0x43e   :  { %v4415_v46 = vpop.eup %4414  ;;  %v2876_v25 = vmul.f32 1.442695, %v2736_v3  ;;  %v2740_v41 = vsub.f32 %v6650_v18, %v6378_v10  ;;  %v2743_v18 = vsub.f32 %v6278_v35, %v6378_v10  ;;  %v6685_v35 = vld [vmem:[#allocation41_spill] sm:$0xff]  ;;  %v2751_v8 = vsub.f32 %v6337_v55, %v6378_v10 }
 0x43f   :  { %v2958_v40 = vadd.f32 %v4395_v7, %v2957_v43  ;;  %v2735_v43 = vsub.f32 %v6684_v48, %v6378_v10  ;;  %v2870_v7 = vmul.f32 1.442695, %v2733_v56  ;;  %4420 = vpow2.f32 %v2868_v16 }
 0x440   :  { %v4417_v51 = vpop.eup %4416  ;;  %v2884_v57 = vmul.f32 1.442695, %v2740_v41  ;;  %v2890_v17 = vmul.f32 1.442695, %v2743_v18  ;;  %v2754_v55 = vsub.f32 %v6327_v63, %v6378_v10 }
 0x441   :  { %v2959_v37 = vadd.f32 %v4397_v27, %v2958_v40  ;;  %v2872_v40 = vmul.f32 1.442695, %v2734_v24  ;;  %4422 = vpow2.f32 %v2870_v7  ;;  %v2874_v62 = vmul.f32 1.442695, %v2735_v43 }
 0x442   :  { %v2894_v24 = vmul.f32 1.442695, %v2745_v1  ;;  %v2749_v7 = vsub.f32 %v6276_v23, %v6378_v10  ;;  %v6687_v23 = vld [vmem:[#allocation44_spill] sm:$0xff] }
 0x443   :  { %v2960_v61 = vadd.f32 %v4399_v31, %v2959_v37  ;;  %v4419_v37 = vpop.eup %4418  ;;  %v2738_v31 = vsub.f32 %v6648_v12, %v6378_v10  ;;  %4424 = vpow2.f32 %v2872_v40  ;;  %v2741_v12 = vsub.f32 %v6651_v60, %v6378_v10 }
 0x444   :  { %4426 = vpow2.f32 %v2874_v62  ;;  %v2744_v60 = vsub.f32 %v6280_v42, %v6378_v10  ;;  %v6686_v42 = vld [vmem:[#allocation43_spill] sm:$0xff]  ;;  %v2750_v40 = vsub.f32 %v6284_v5, %v6378_v10  ;;  %v2902_v62 = vmul.f32 1.442695, %v2749_v7 }
 0x445   :  { %v2961_v49 = vadd.f32 %v4401_v11, %v2960_v61  ;;  %v4421_v29 = vpop.eup %4420  ;;  %v2878_v61 = vmul.f32 1.442695, %v2737_v54  ;;  %4428 = vpow2.f32 %v2876_v25  ;;  %v2880_v21 = vmul.f32 1.442695, %v2738_v31 }
 0x446   :  { %v2886_v59 = vmul.f32 1.442695, %v2741_v12  ;;  %v2892_v56 = vmul.f32 1.442695, %v2744_v60  ;;  %v2752_v31 = vsub.f32 %v6687_v23, %v6378_v10  ;;  %v2904_v25 = vmul.f32 1.442695, %v2750_v40 }
 0x447   :  { %v2962_v33 = vadd.f32 %v4403_v14, %v2961_v49  ;;  %v4423_v19 = vpop.eup %4422  ;;  %4430 = vpow2.f32 %v2878_v61  ;;  %v2882_v14 = vmul.f32 1.442695, %v2739_v28  ;;  %v2753_v5 = vsub.f32 %v6655_v38, %v6378_v10 }
 0x448   :  { %4432 = vpow2.f32 %v2880_v21  ;;  %v2906_v28 = vmul.f32 1.442695, %v2751_v8  ;;  %v2912_v38 = vmul.f32 1.442695, %v2754_v55 }
 0x449   :  { %v2963_v44 = vadd.f32 %v4405_v50, %v2962_v33  ;;  %v4425_v49 = vpop.eup %4424  ;;  %4434 = vpow2.f32 %v2882_v14  ;;  %v2910_v12 = vmul.f32 1.442695, %v2753_v5 }
 0x44a   :  { %v4427_v39 = vpop.eup %4426  ;;  %4436 = vpow2.f32 %v2884_v57 }
 0x44b   :  { %v2964_v32 = vadd.f32 %v4407_v0, %v2963_v44  ;;  %v4429_v50 = vpop.eup %4428  ;;  %v2888_v44 = vmul.f32 1.442695, %v2742_v52  ;;  %4438 = vpow2.f32 %v2886_v59 }
 0x44d   :  { %v2965_v26 = vadd.f32 %v4409_v13, %v2964_v32  ;;  %v4431_v58 = vpop.eup %4430  ;;  %v2746_v13 = vsub.f32 %v6685_v35, %v6378_v10  ;;  %4440 = vpow2.f32 %v2888_v44  ;;  %v3006_v35 = vpop.xlane.xlu2 %3005 }
 0x44e   :  { %v4433_v53 = vpop.eup %4432  ;;  %4442 = vpow2.f32 %v2890_v17 }
 0x44f   :  { %v2966_v6 = vadd.f32 %v4411_v34, %v2965_v26  ;;  %v4435_v32 = vpop.eup %4434  ;;  %v2747_v34 = vsub.f32 %v6686_v42, %v6378_v10  ;;  %4444 = vpow2.f32 %v2892_v56 }
 0x450   :  { %v4437_v26 = vpop.eup %4436  ;;  %4446 = vpow2.f32 %v2894_v24 }
 0x451   :  { %v2967_v2 = vadd.f32 %v4413_v47, %v2966_v6  ;;  %v4439_v6 = vpop.eup %4438  ;;  %v2896_v47 = vmul.f32 1.442695, %v2746_v13 }
 0x453   :  { %v2968_v27 = vadd.f32 %v4415_v46, %v2967_v2  ;;  %v4441_v43 = vpop.eup %4440  ;;  %v2898_v2 = vmul.f32 1.442695, %v2747_v34  ;;  %4448 = vpow2.f32 %v2896_v47 }
 0x454   :  { %v4443_v3 = vpop.eup %4442 }
 0x455   :  { %v2969_v15 = vadd.f32 %v4417_v51, %v2968_v27  ;;  %v2900_v27 = vmul.f32 1.442695, %v2748_v9  ;;  %v4445_v54 = vpop.eup %4444  ;;  %4450 = vpow2.f32 %v2898_v2 }
 0x457   :  { %v2970_v36 = vadd.f32 %v4419_v37, %v2969_v15  ;;  %v4447_v37 = vpop.eup %4446  ;;  %4452 = vpow2.f32 %v2900_v27 }
 0x458   :  { %4454 = vpow2.f32 %v2902_v62 }
 0x459   :  { %v2971_v11 = vadd.f32 %v4421_v29, %v2970_v36  ;;  %v4449_v29 = vpop.eup %4448  ;;  %4456 = vpow2.f32 %v2904_v25 }
 0x45a   :  { %4458 = vpow2.f32 %v2906_v28 }
 0x45b   :  { %v2972_v30 = vadd.f32 %v4423_v19, %v2971_v11  ;;  %v4451_v11 = vpop.eup %4450  ;;  %v2908_v19 = vmul.f32 1.442695, %v2752_v31 }
 0x45d   :  { %v2973_v4 = vadd.f32 %v4425_v49, %v2972_v30  ;;  %v4453_v21 = vpop.eup %4452  ;;  %v6688_v30 = vld [vmem:[#allocation22_spill] sm:$0xff]  ;;  %4460 = vpow2.f32 %v2908_v19 }
 0x45e   :  { %v2755_v49 = vsub.f32 %v6688_v30, %v6378_v10  ;;  %4462 = vpow2.f32 %v2910_v12 }
 0x45f   :  { %v2974_v33 = vadd.f32 %v4427_v39, %v2973_v4  ;;  %v4455_v4 = vpop.eup %4454  ;;  %4464 = vpow2.f32 %v2912_v38 }
 0x460   :  { %v4457_v52 = vpop.eup %4456  ;;  %v2914_v57 = vmul.f32 1.442695, %v2755_v49 }
 0x461   :  { %v2975_v20 = vadd.f32 %v4429_v50, %v2974_v33  ;;  %v4459_v50 = vpop.eup %4458 }
 0x462   :  { %4466 = vpow2.f32 %v2914_v57 }
 0x463   :  { %v2976_v0 = vadd.f32 %v4431_v58, %v2975_v20  ;;  %v4461_v18 = vpop.eup %4460 }
 0x464   :  { %v4463_v20 = vpop.eup %4462 }
 0x465   :  { %v2977_v22 = vadd.f32 %v4433_v53, %v2976_v0  ;;  %v4465_v60 = vpop.eup %4464 }
 0x467   :  { %v2978_v45 = vadd.f32 %v4435_v32, %v2977_v22 }
 0x468   :  { %v4467_v0 = vpop.eup %4466 }
 0x469   :  { %v2979_v16 = vadd.f32 %v4437_v26, %v2978_v45 }
 0x46b   :  { %v2980_v48 = vadd.f32 %v4439_v6, %v2979_v16 }
 0x46d   :  { %v2981_v46 = vadd.f32 %v4441_v43, %v2980_v48 }
 0x46f   :  { %v2982_v51 = vadd.f32 %v4443_v3, %v2981_v46 }
 0x471   :  { %v2983_v15 = vadd.f32 %v4445_v54, %v2982_v51 }
 0x473   :  { %v2984_v36 = vadd.f32 %v4447_v37, %v2983_v15 }
 0x475   :  { %v2985_v61 = vadd.f32 %v4449_v29, %v2984_v36 }
 0x477   :  { %v2986_v41 = vadd.f32 %v4451_v11, %v2985_v61 }
 0x479   :  { %v2987_v14 = vadd.f32 %v4453_v21, %v2986_v41 }
 0x47b   :  { %v2988_v39 = vadd.f32 %v4455_v4, %v2987_v14 }
 0x47d   :  { %v2989_v33 = vadd.f32 %v4457_v52, %v2988_v39 }
 0x47f   :  { %v2990_v63 = vadd.f32 %v4459_v50, %v2989_v33 }
 0x481   :  { %v2991_v59 = vadd.f32 %v4461_v18, %v2990_v63 }
 0x483   :  { %v2992_v58 = vadd.f32 %v4463_v20, %v2991_v59 }
 0x485   :  { %v2993_v44 = vadd.f32 %v4465_v60, %v2992_v58 }
 0x487   :  { %v2994_v53 = vadd.f32 %v4467_v0, %v2993_v44 }
 0x489   :  { %2995 = vadd.xlane.f32.xlu1 %v2994_v53 }
 0x4fc   :  { %v2996_v1 = vpop.xlane.xlu1 %2995 }
 0x4fd   :  { %4468 = vlog2.f32 %v2996_v1 }
 0x503   :  { %v4469_v17 = vpop.eup %4468 }
 0x504   :  { %v2998_v22 = vmul.f32 0.6931472, %v4469_v17 }
 0x506   :  { %v2999_v32 = vadd.f32 %v2998_v22, %v6378_v10 }
 0x508   :  { %v3007_v13 = vsub.f32 %v2999_v32, %v3006_v35 }
 0x50a   :  { %3009 = vst.msk [vmem:[%s6548_s4] sm:$0xff] %vm3008_vm2, %v3007_v13 }

</bundles_post_ra>
